<compile_context>
chip_gen: v6e
topology: v6e:2x2x1
jax: 0.10.0
libtpu: 0.0.40
codegen_flags: <defaults>
</compile_context>

<pallas_src>
import math
import functools

import jax
import jax.numpy as jnp
from jax import lax
from jax.experimental import pallas as pl
from jax.experimental.pallas import tpu as pltpu


def _silu(x):
    return x * jax.nn.sigmoid(x)


def _softplus(x):
    # numerically-safe softplus
    return jnp.where(x > 20.0, x, jnp.log1p(jnp.exp(jnp.minimum(x, 20.0))))


def _bf16_dot(a, b):
    """bf16 x bf16 matmul with f32 accumulation (MXU-friendly)."""
    return jnp.dot(a.astype(jnp.bfloat16), b.astype(jnp.bfloat16),
                   preferred_element_type=jnp.float32)


# ----------------------------------------------------------------------------
# Pallas kernel: one (batch, sequence-chunk) tile per grid step.
# ----------------------------------------------------------------------------
def mamba_kernel(h_ref, w_in_ref, conv_w_ref, conv_b_ref, w_x_ref, w_dt_ref,
                 dt_bias_ref, a_ref, d_ref, w_out_ref,
                 out_ref, convst_ref, ssmst_ref,
                 xtail_ref, xconv_ref, delta_ref, z_ref, y_ref, b_ref, c_ref,
                 *, d_inner, d_state, d_conv, dt_rank, chunk_len):
    chunk = pl.program_id(1)

    # ---- (re)initialize carried state at the first chunk of each batch elem ----
    @pl.when(chunk == 0)
    def _():
        xtail_ref[...] = jnp.zeros((d_conv - 1, d_inner), jnp.float32)
        ssmst_ref[0] = jnp.zeros((d_state, d_inner), jnp.float32)

    h = h_ref[0]                                                  # (Lc, d_model)

    # ---- fused in_proj (bias=False): one bf16 matmul, slice x / z halves ----
    xz = _bf16_dot(h, w_in_ref[...])                              # (Lc, 2*d_inner)
    x = xz[:, :d_inner]
    z_ref[0:chunk_len, :] = _silu(xz[:, d_inner:])

    # ---- causal depthwise conv1d (+bias) + SiLU; taps are lane-dense rows ----
    x_pad = jnp.concatenate([xtail_ref[...], x], axis=0)          # (Lc+d_conv-1, d_inner)
    acc = conv_b_ref[...] + conv_w_ref[0:1, :] * x_pad[0:chunk_len, :]
    for k in range(1, d_conv):
        acc = acc + conv_w_ref[k:k + 1, :] * x_pad[k:k + chunk_len, :]
    xconv_ref[0:chunk_len, :] = _silu(acc)
    xtail_ref[...] = x_pad[chunk_len:, :]                         # pre-conv tail carry

    # ---- fused x_proj -> (dt_low | B | C), then dt_proj + softplus ----
    xdbl = _bf16_dot(xconv_ref[0:chunk_len, :], w_x_ref[...])     # (Lc, dt_rank+2*d_state)
    b_ref[0:chunk_len, :] = xdbl[:, dt_rank:dt_rank + d_state]
    c_ref[0:chunk_len, :] = xdbl[:, dt_rank + d_state:]
    delta_ref[0:chunk_len, :] = _softplus(
        _bf16_dot(xdbl[:, :dt_rank], w_dt_ref[...]) + dt_bias_ref[...])

    # ---- selective scan: fori_loop over 8-row groups, unrolled inside ----
    a_t = a_ref[...]                                              # (d_state, d_inner)

    def scan_rows(start, count, state):
        dt_blk = delta_ref[pl.ds(start, 8), :]                    # (8, d_inner)
        u_blk = xconv_ref[pl.ds(start, 8), :]                     # (8, d_inner)
        bT_blk = jnp.transpose(b_ref[pl.ds(start, 8), :])         # (d_state, 8)
        c_blk = c_ref[pl.ds(start, 8), :]                         # (8, d_state)
        ys = []
        for j in range(count):
            dt_j = dt_blk[j:j + 1, :]                             # (1, d_inner)
            dtu = dt_j * u_blk[j:j + 1, :]                        # (1, d_inner)
            dA = jnp.exp(dt_j * a_t)                              # (d_state, d_inner)
            state = dA * state + bT_blk[:, j:j + 1] * dtu
            ys.append(jnp.dot(c_blk[j:j + 1, :], state,           # MXU, not XLU reduce
                              preferred_element_type=jnp.float32))
        y_ref[pl.ds(start, count), :] = jnp.concatenate(ys, axis=0)
        return state

    n_full, rem = chunk_len // 8, chunk_len % 8
    state = ssmst_ref[0]
    if n_full > 0:
        state = lax.fori_loop(
            0, n_full,
            lambda g, st: scan_rows(pl.multiple_of(g * 8, 8), 8, st),
            state)
    if rem > 0:
        state = scan_rows(n_full * 8, rem, state)
    ssmst_ref[0] = state
    # TODO(synk): SSD-style chunked matmul formulation of the scan (MXU) and a
    # d_inner-parallel grid axis for very large d_inner remain future work.

    # ---- D skip, gating, out_proj ----
    y = (y_ref[0:chunk_len, :] + xconv_ref[0:chunk_len, :] * d_ref[...]) \
        * z_ref[0:chunk_len, :]
    out_ref[0] = _bf16_dot(y, w_out_ref[...])

    # conv_state (this module's state=None branch keeps post-conv/post-act x);
    # only the last chunk's write survives the final HBM writeback.
    convst_ref[0] = xconv_ref[chunk_len - (d_conv - 1):chunk_len, :]
    # TODO(synk): incremental-decode path (caller conv_state/ssm_state,
    # causal_conv1d_update) and the seqlen < d_conv-1 padding case are not implemented.


# ----------------------------------------------------------------------------
# Chunk-size selection (VMEM-budget aware; v7x has half the VMEM of v5e/v6e)
# ----------------------------------------------------------------------------
def _pick_chunk_len(seqlen, d_inner, max_chunk_len=None):
    if max_chunk_len is None:
        try:
            vmem_bytes = pltpu.get_tpu_info().vmem_capacity_bytes
        except Exception:
            vmem_bytes = 64 * 1024 * 1024
        # ~6 live f32 (Lc, d_inner) slabs per chunk; keep them within ~1/4 of VMEM.
        rows = (vmem_bytes // 4) // (6 * 4 * max(d_inner, 128))
        max_chunk_len = max(8, (int(rows) // 8) * 8)
    if seqlen <= max_chunk_len:
        return seqlen
    best = None
    for cand in range(8, max_chunk_len + 1, 8):
        if seqlen % cand == 0:
            best = cand
    if best is None:
        # TODO(synk): mask ragged tails instead of a single full-length chunk.
        return seqlen
    return best


# ----------------------------------------------------------------------------
# Wrapper
# ----------------------------------------------------------------------------
def mamba_forward(hidden, params, *, d_inner, d_state, d_conv, dt_rank,
                  max_chunk_len=None):
    hidden = hidden.astype(jnp.float32)
    B, L, D = hidden.shape
    chunk_len = _pick_chunk_len(L, d_inner, max_chunk_len)
    n_chunks = L // chunk_len
    assert n_chunks * chunk_len == L
    lc_pad = ((chunk_len + 7) // 8) * 8

    kernel = functools.partial(
        mamba_kernel, d_inner=d_inner, d_state=d_state, d_conv=d_conv,
        dt_rank=dt_rank, chunk_len=chunk_len)

    f32, bf16 = jnp.float32, jnp.bfloat16
    # Big projection weights in bf16 (halves DMA/VMEM, feeds MXU at full rate);
    # element-wise parameters stay f32.
    weights = [
        params["w_in"].astype(bf16), params["conv_w"].astype(f32),
        params["conv_b"].astype(f32), params["w_x"].astype(bf16),
        params["w_dt"].astype(bf16), params["dt_bias"].astype(f32),
        params["A_t"].astype(f32), params["D"].astype(f32),
        params["w_out"].astype(bf16),
    ]

    def _const_spec(arr):
        zeros = (0,) * arr.ndim
        # TODO(synk): single-buffer these constant blocks (pl.Buffered(1)) once
        # pipeline_mode is plumbed through for top-level pallas_call operands.
        return pl.BlockSpec(arr.shape, lambda b, c, _z=zeros: _z)

    in_specs = [pl.BlockSpec((1, chunk_len, D), lambda b, c: (b, c, 0))] + \
               [_const_spec(w) for w in weights]
    out_specs = (
        pl.BlockSpec((1, chunk_len, D), lambda b, c: (b, c, 0)),
        pl.BlockSpec((1, d_conv - 1, d_inner), lambda b, c: (b, 0, 0)),
        pl.BlockSpec((1, d_state, d_inner), lambda b, c: (b, 0, 0)),
    )
    out_shapes = (
        jax.ShapeDtypeStruct((B, L, D), jnp.float32),
        jax.ShapeDtypeStruct((B, d_conv - 1, d_inner), jnp.float32),
        jax.ShapeDtypeStruct((B, d_state, d_inner), jnp.float32),
    )
    scratch_shapes = [
        pltpu.VMEM((d_conv - 1, d_inner), f32),    # pre-conv x tail carry
        pltpu.VMEM((lc_pad, d_inner), f32),        # x_conv
        pltpu.VMEM((lc_pad, d_inner), f32),        # delta
        pltpu.VMEM((lc_pad, d_inner), f32),        # silu(z)
        pltpu.VMEM((lc_pad, d_inner), f32),        # y
        pltpu.VMEM((lc_pad, d_state), f32),        # B
        pltpu.VMEM((lc_pad, d_state), f32),        # C
    ]

    weight_bytes = sum(int(w.size) * w.dtype.itemsize for w in weights)
    scratch_bytes = 4 * (5 * lc_pad * d_inner + 2 * lc_pad * d_state
                         + (d_conv - 1) * d_inner)
    block_bytes = 4 * (2 * chunk_len * D + (d_conv - 1) * d_inner
                       + d_state * d_inner)
    vmem_limit = int(min(64 * 1024 * 1024,
                         max(32 * 1024 * 1024,
                             2 * (weight_bytes + 2 * block_bytes)
                             + 2 * scratch_bytes)))

    proj_flops = 2 * B * L * (D * 2 * d_inner
                              + d_inner * (dt_rank + 2 * d_state)
                              + dt_rank * d_inner + d_inner * D)
    scan_flops = 8 * B * L * d_state * d_inner + 2 * B * L * d_conv * d_inner
    cost = pl.CostEstimate(
        flops=int(proj_flops + scan_flops),
        transcendentals=int(B * L * (d_state * d_inner + 3 * d_inner)),
        bytes_accessed=int(hidden.size * 4 + weight_bytes + B * L * D * 4
                           + B * (d_conv - 1) * d_inner * 4
                           + B * d_state * d_inner * 4),
    )

    out, conv_state, ssm_state = pl.pallas_call(
        kernel,
        out_shape=out_shapes,
        grid_spec=pltpu.PrefetchScalarGridSpec(
            num_scalar_prefetch=0,
            grid=(B, n_chunks),
            in_specs=in_specs,
            out_specs=out_specs,
            scratch_shapes=scratch_shapes,
        ),
        compiler_params=pltpu.CompilerParams(
            dimension_semantics=("parallel", "arbitrary"),
            vmem_limit_bytes=vmem_limit,
        ),
        cost_estimate=cost,
    )(hidden, *weights)

    # Match PyTorch state conventions: (B, d_inner, d_conv-1), (B, d_inner, d_state)
    conv_state = jnp.transpose(conv_state, (0, 2, 1))
    ssm_state = jnp.transpose(ssm_state, (0, 2, 1))
    return out, (conv_state, ssm_state)


# ----------------------------------------------------------------------------
# Pure-JAX reference (same math incl. bf16 matmuls) for validation
# ----------------------------------------------------------------------------
def mamba_reference(hidden, p, *, d_inner, d_state, d_conv, dt_rank):
    B, L, D = hidden.shape
    xz = _bf16_dot(hidden, p["w_in"])
    x, z = xz[..., :d_inner], xz[..., d_inner:]
    x_pad = jnp.pad(x, ((0, 0), (d_conv - 1, 0), (0, 0)))
    acc = p["conv_b"][None] + p["conv_w"][0][None, None, :] * x_pad[:, 0:L, :]
    for k in range(1, d_conv):
        acc = acc + p["conv_w"][k][None, None, :] * x_pad[:, k:k + L, :]
    x_conv = _silu(acc)

    x_dbl = _bf16_dot(x_conv, p["w_x"])
    dt_low = x_dbl[..., :dt_rank]
    b_seq = x_dbl[..., dt_rank:dt_rank + d_state]
    c_seq = x_dbl[..., dt_rank + d_state:]
    delta = _softplus(_bf16_dot(dt_low, p["w_dt"]) + p["dt_bias"])

    A = jnp.transpose(p["A_t"])                                   # (d_inner, d_state)

    def step(state, inp):
        dt_t, u_t, b_t, c_t = inp
        dA = jnp.exp(dt_t[:, :, None] * A[None])
        state = dA * state + (dt_t * u_t)[:, :, None] * b_t[:, None, :]
        y_t = jnp.sum(state * c_t[:, None, :], axis=-1)
        return state, y_t

    init = jnp.zeros((B, d_inner, d_state), jnp.float32)
    xs = (jnp.swapaxes(delta, 0, 1), jnp.swapaxes(x_conv, 0, 1),
          jnp.swapaxes(b_seq, 0, 1), jnp.swapaxes(c_seq, 0, 1))
    last_state, ys = jax.lax.scan(step, init, xs)
    y = jnp.swapaxes(ys, 0, 1)
    y = (y + x_conv * p["D"]) * _silu(z)
    out = _bf16_dot(y, p["w_out"])
    conv_state = jnp.swapaxes(x_conv[:, L - (d_conv - 1):, :], 1, 2)
    return out, conv_state, last_state


# ----------------------------------------------------------------------------
# Deterministic parameter construction (mirrors Mamba.__init__ shapes)
# ----------------------------------------------------------------------------
def make_params(key, d_model, d_state, d_conv, expand,
                dt_min=0.001, dt_max=0.1, dt_init_floor=1e-4):
    d_inner = int(expand * d_model)
    dt_rank = math.ceil(d_model / 16)
    ks = jax.random.split(key, 7)

    w_in = jax.random.normal(ks[0], (d_model, 2 * d_inner), jnp.float32) / math.sqrt(d_model)
    conv_w = jax.random.normal(ks[1], (d_conv, d_inner), jnp.float32) / math.sqrt(d_conv)
    conv_b = 0.1 * jax.random.normal(ks[2], (1, d_inner), jnp.float32)
    w_x = jax.random.normal(ks[3], (d_inner, dt_rank + 2 * d_state), jnp.float32) / math.sqrt(d_inner)

    dt_init_std = dt_rank ** (-0.5)
    w_dt = jax.random.uniform(ks[4], (dt_rank, d_inner), jnp.float32,
                              minval=-dt_init_std, maxval=dt_init_std)
    dt_val = jnp.exp(jax.random.uniform(ks[5], (d_inner,), jnp.float32)
                     * (math.log(dt_max) - math.log(dt_min)) + math.log(dt_min))
    dt_val = jnp.maximum(dt_val, dt_init_floor)
    inv_dt = dt_val + jnp.log(-jnp.expm1(-dt_val))
    dt_bias = inv_dt.reshape(1, d_inner).astype(jnp.float32)

    # A_log = log(arange(1, d_state+1)) broadcast over d_inner; A = -exp(A_log)
    A = -jnp.broadcast_to(jnp.arange(1, d_state + 1, dtype=jnp.float32),
                          (d_inner, d_state))
    A_t = jnp.transpose(A)                                        # (d_state, d_inner)
    D_vec = jnp.ones((1, d_inner), jnp.float32)
    w_out = jax.random.normal(ks[6], (d_inner, d_model), jnp.float32) / math.sqrt(d_inner)

    params = dict(w_in=w_in, conv_w=conv_w, conv_b=conv_b, w_x=w_x,
                  w_dt=w_dt, dt_bias=dt_bias, A_t=A_t, D=D_vec, w_out=w_out)
    return params, d_inner, dt_rank


if __name__ == "__main__":
    d_model, d_state, d_conv, expand = 32, 16, 4, 2
    key = jax.random.PRNGKey(0)
    pkey, k1, k2 = jax.random.split(key, 3)
    params, d_inner, dt_rank = make_params(pkey, d_model, d_state, d_conv, expand)

    def check(hidden, max_chunk_len=None):
        out, (conv_state, ssm_state) = mamba_forward(
            hidden, params, d_inner=d_inner, d_state=d_state, d_conv=d_conv,
            dt_rank=dt_rank, max_chunk_len=max_chunk_len)
        out = jax.block_until_ready(out)
        conv_state = jax.block_until_ready(conv_state)
        ssm_state = jax.block_until_ready(ssm_state)
        ref_out, ref_conv, ref_ssm = mamba_reference(
            hidden, params, d_inner=d_inner, d_state=d_state, d_conv=d_conv,
            dt_rank=dt_rank)
        assert jnp.allclose(out, ref_out, rtol=1e-2, atol=1e-2), "output mismatch"
        assert jnp.allclose(conv_state, ref_conv, rtol=1e-2, atol=1e-2), "conv_state mismatch"
        assert jnp.allclose(ssm_state, ref_ssm, rtol=1e-2, atol=1e-2), "ssm_state mismatch"

    # Small single-chunk case.
    check(jax.random.normal(k1, (2, 8, d_model), jnp.float32))
    # Multi-chunk case: exercises the carried conv tail / SSM state across chunks.
    check(jax.random.normal(k2, (2, 64, d_model), jnp.float32), max_chunk_len=16)

    print("KERNEL_OK")
</pallas_src>

<mosaic_0001>
module attributes {stable_mosaic.version = 11 : i64} {
  func.func @mamba_kernel(%arg0: i32, %arg1: i32, %arg2: memref<1x8x32xf32, #tpu.memory_space<vmem>>, %arg3: memref<32x128xbf16, #tpu.memory_space<vmem>>, %arg4: memref<4x64xf32, #tpu.memory_space<vmem>>, %arg5: memref<1x64xf32, #tpu.memory_space<vmem>>, %arg6: memref<64x34xbf16, #tpu.memory_space<vmem>>, %arg7: memref<2x64xbf16, #tpu.memory_space<vmem>>, %arg8: memref<1x64xf32, #tpu.memory_space<vmem>>, %arg9: memref<16x64xf32, #tpu.memory_space<vmem>>, %arg10: memref<1x64xf32, #tpu.memory_space<vmem>>, %arg11: memref<64x32xbf16, #tpu.memory_space<vmem>>, %arg12: memref<1x8x32xf32, #tpu.memory_space<vmem>>, %arg13: memref<1x3x64xf32, #tpu.memory_space<vmem>>, %arg14: memref<1x16x64xf32, #tpu.memory_space<vmem>>, %arg15: memref<3x64xf32, #tpu.memory_space<vmem>>, %arg16: memref<8x64xf32, #tpu.memory_space<vmem>>, %arg17: memref<8x64xf32, #tpu.memory_space<vmem>>, %arg18: memref<8x64xf32, #tpu.memory_space<vmem>>, %arg19: memref<8x64xf32, #tpu.memory_space<vmem>>, %arg20: memref<8x16xf32, #tpu.memory_space<vmem>>, %arg21: memref<8x16xf32, #tpu.memory_space<vmem>>) attributes {dimension_semantics = [#tpu.dimension_semantics<parallel>, #tpu.dimension_semantics<arbitrary>], iteration_bounds = array<i64: 2, 1>, scalar_prefetch = 0 : i64, scratch_operands = 7 : i64, tpu.core_type = #tpu.core_type<tc>, window_params = [{transform_indices = @transform_0, window_bounds = array<i64: 1, 8, 32>}, {pipeline_mode = #tpu.pipeline_mode<synchronous>, transform_indices = @transform_1, window_bounds = array<i64: 32, 128>}, {pipeline_mode = #tpu.pipeline_mode<synchronous>, transform_indices = @transform_2, window_bounds = array<i64: 4, 64>}, {pipeline_mode = #tpu.pipeline_mode<synchronous>, transform_indices = @transform_3, window_bounds = array<i64: 1, 64>}, {pipeline_mode = #tpu.pipeline_mode<synchronous>, transform_indices = @transform_4, window_bounds = array<i64: 64, 34>}, {pipeline_mode = #tpu.pipeline_mode<synchronous>, transform_indices = @transform_5, window_bounds = array<i64: 2, 64>}, {pipeline_mode = #tpu.pipeline_mode<synchronous>, transform_indices = @transform_6, window_bounds = array<i64: 1, 64>}, {pipeline_mode = #tpu.pipeline_mode<synchronous>, transform_indices = @transform_7, window_bounds = array<i64: 16, 64>}, {pipeline_mode = #tpu.pipeline_mode<synchronous>, transform_indices = @transform_8, window_bounds = array<i64: 1, 64>}, {pipeline_mode = #tpu.pipeline_mode<synchronous>, transform_indices = @transform_9, window_bounds = array<i64: 64, 32>}, {transform_indices = @transform_10, window_bounds = array<i64: 1, 8, 32>}, {transform_indices = @transform_11, window_bounds = array<i64: 1, 3, 64>}, {transform_indices = @transform_12, window_bounds = array<i64: 1, 16, 64>}]} {
    %c0_i32 = arith.constant 0 : i32
    %0 = arith.cmpi eq, %arg1, %c0_i32 : i32
    %1 = arith.extui %0 : i1 to i32
    %c0_i32_0 = arith.constant 0 : i32
    %2 = arith.cmpi ne, %1, %c0_i32_0 : i32
    scf.if %2 {
      %cst_80 = arith.constant 0.000000e+00 : f32
      %223 = vector.broadcast %cst_80 : f32 to vector<3x64xf32>
      %c0_81 = arith.constant 0 : index
      %c0_82 = arith.constant 0 : index
      %224 = vector.load %arg15[%c0_81, %c0_82] : memref<3x64xf32, #tpu.memory_space<vmem>>, vector<3x64xf32>
      tpu.vector_store %arg15[%c0_81, %c0_82], %223 {strides = array<i32>} : memref<3x64xf32, #tpu.memory_space<vmem>>, vector<3x64xf32>,
      %cst_83 = arith.constant 0.000000e+00 : f32
      %225 = vector.broadcast %cst_83 : f32 to vector<16x64xf32>
      %c0_84 = arith.constant 0 : index
      %c0_85 = arith.constant 0 : index
      %c0_86 = arith.constant 0 : index
      %226 = vector.load %arg14[%c0_84, %c0_85, %c0_86] : memref<1x16x64xf32, #tpu.memory_space<vmem>>, vector<1x16x64xf32>
      %227 = vector.shape_cast %226 : vector<1x16x64xf32> to vector<16x64xf32>
      %228 = vector.shape_cast %225 : vector<16x64xf32> to vector<1x16x64xf32>
      tpu.vector_store %arg14[%c0_84, %c0_85, %c0_86], %228 {strides = array<i32>} : memref<1x16x64xf32, #tpu.memory_space<vmem>>, vector<1x16x64xf32>,
    } else {
    }
    %c0 = arith.constant 0 : index
    %c0_1 = arith.constant 0 : index
    %c0_2 = arith.constant 0 : index
    %3 = vector.load %arg2[%c0, %c0_1, %c0_2] : memref<1x8x32xf32, #tpu.memory_space<vmem>>, vector<1x8x32xf32>
    %4 = vector.shape_cast %3 : vector<1x8x32xf32> to vector<8x32xf32>
    %c0_3 = arith.constant 0 : index
    %c0_4 = arith.constant 0 : index
    %5 = vector.load %arg3[%c0_3, %c0_4] : memref<32x128xbf16, #tpu.memory_space<vmem>>, vector<32x128xbf16>
    %6 = arith.truncf %4 : vector<8x32xf32> to vector<8x32xbf16>
    %cst = arith.constant dense<0.000000e+00> : vector<8x128xf32>
    %7 = tpu.matmul %6, %5, %cst {dimension_numbers = #tpu.dot_dimension_numbers<[1], [0], [0], [1], [0, 0, 1, 1], [], []>} : vector<8x32xbf16>, vector<32x128xbf16>, vector<8x128xf32> -> vector<8x128xf32>
    %8 = vector.extract_strided_slice %7 {offsets = [0, 0], sizes = [8, 64], strides = [1, 1]} : vector<8x128xf32> to vector<8x64xf32>
    %9 = vector.extract_strided_slice %7 {offsets = [0, 64], sizes = [8, 64], strides = [1, 1]} : vector<8x128xf32> to vector<8x64xf32>
    %10 = arith.negf %9 : vector<8x64xf32>
    %11 = math.exp %10 : vector<8x64xf32>
    %cst_5 = arith.constant 1.000000e+00 : f32
    %12 = vector.broadcast %cst_5 : f32 to vector<8x64xf32>
    %13 = arith.addf %12, %11 : vector<8x64xf32>
    %14 = arith.divf %12, %13 : vector<8x64xf32>
    %15 = arith.mulf %9, %14 : vector<8x64xf32>
    %c0_6 = arith.constant 0 : index
    %c0_7 = arith.constant 0 : index
    %16 = vector.load %arg18[%c0_6, %c0_7] : memref<8x64xf32, #tpu.memory_space<vmem>>, vector<8x64xf32>
    tpu.vector_store %arg18[%c0_6, %c0_7], %15 {strides = array<i32>} : memref<8x64xf32, #tpu.memory_space<vmem>>, vector<8x64xf32>,
    %c0_8 = arith.constant 0 : index
    %c0_9 = arith.constant 0 : index
    %17 = vector.load %arg15[%c0_8, %c0_9] : memref<3x64xf32, #tpu.memory_space<vmem>>, vector<3x64xf32>
    %18 = tpu.concatenate %17, %8 in 0 : vector<3x64xf32>, vector<8x64xf32> -> vector<11x64xf32>
    %c0_10 = arith.constant 0 : index
    %c0_11 = arith.constant 0 : index
    %19 = vector.load %arg5[%c0_10, %c0_11] : memref<1x64xf32, #tpu.memory_space<vmem>>, vector<1x64xf32>
    %c0_12 = arith.constant 0 : index
    %c0_13 = arith.constant 0 : index
    %20 = vector.load %arg4[%c0_12, %c0_13] : memref<4x64xf32, #tpu.memory_space<vmem>>, vector<1x64xf32>
    %21 = vector.extract_strided_slice %18 {offsets = [0, 0], sizes = [8, 64], strides = [1, 1]} : vector<11x64xf32> to vector<8x64xf32>
    %22 = vector.broadcast %20 : vector<1x64xf32> to vector<8x64xf32>
    %23 = arith.mulf %22, %21 : vector<8x64xf32>
    %24 = vector.broadcast %19 : vector<1x64xf32> to vector<8x64xf32>
    %25 = arith.addf %24, %23 : vector<8x64xf32>
    %c1 = arith.constant 1 : index
    %c0_14 = arith.constant 0 : index
    %26 = vector.load %arg4[%c1, %c0_14] : memref<4x64xf32, #tpu.memory_space<vmem>>, vector<1x64xf32>
    %27 = vector.extract_strided_slice %18 {offsets = [1, 0], sizes = [8, 64], strides = [1, 1]} : vector<11x64xf32> to vector<8x64xf32>
    %28 = vector.broadcast %26 : vector<1x64xf32> to vector<8x64xf32>
    %29 = arith.mulf %28, %27 : vector<8x64xf32>
    %30 = arith.addf %25, %29 : vector<8x64xf32>
    %c2 = arith.constant 2 : index
    %c0_15 = arith.constant 0 : index
    %31 = vector.load %arg4[%c2, %c0_15] : memref<4x64xf32, #tpu.memory_space<vmem>>, vector<1x64xf32>
    %32 = vector.extract_strided_slice %18 {offsets = [2, 0], sizes = [8, 64], strides = [1, 1]} : vector<11x64xf32> to vector<8x64xf32>
    %33 = vector.broadcast %31 : vector<1x64xf32> to vector<8x64xf32>
    %34 = arith.mulf %33, %32 : vector<8x64xf32>
    %35 = arith.addf %30, %34 : vector<8x64xf32>
    %c3 = arith.constant 3 : index
    %c0_16 = arith.constant 0 : index
    %36 = vector.load %arg4[%c3, %c0_16] : memref<4x64xf32, #tpu.memory_space<vmem>>, vector<1x64xf32>
    %37 = vector.extract_strided_slice %18 {offsets = [3, 0], sizes = [8, 64], strides = [1, 1]} : vector<11x64xf32> to vector<8x64xf32>
    %38 = vector.broadcast %36 : vector<1x64xf32> to vector<8x64xf32>
    %39 = arith.mulf %38, %37 : vector<8x64xf32>
    %40 = arith.addf %35, %39 : vector<8x64xf32>
    %41 = arith.negf %40 : vector<8x64xf32>
    %42 = math.exp %41 : vector<8x64xf32>
    %cst_17 = arith.constant 1.000000e+00 : f32
    %43 = vector.broadcast %cst_17 : f32 to vector<8x64xf32>
    %44 = arith.addf %43, %42 : vector<8x64xf32>
    %45 = arith.divf %43, %44 : vector<8x64xf32>
    %46 = arith.mulf %40, %45 : vector<8x64xf32>
    %c0_18 = arith.constant 0 : index
    %c0_19 = arith.constant 0 : index
    %47 = vector.load %arg16[%c0_18, %c0_19] : memref<8x64xf32, #tpu.memory_space<vmem>>, vector<8x64xf32>
    tpu.vector_store %arg16[%c0_18, %c0_19], %46 {strides = array<i32>} : memref<8x64xf32, #tpu.memory_space<vmem>>, vector<8x64xf32>,
    %48 = vector.extract_strided_slice %18 {offsets = [8, 0], sizes = [3, 64], strides = [1, 1]} : vector<11x64xf32> to vector<3x64xf32>
    %c0_20 = arith.constant 0 : index
    %c0_21 = arith.constant 0 : index
    %49 = vector.load %arg15[%c0_20, %c0_21] : memref<3x64xf32, #tpu.memory_space<vmem>>, vector<3x64xf32>
    tpu.vector_store %arg15[%c0_20, %c0_21], %48 {strides = array<i32>} : memref<3x64xf32, #tpu.memory_space<vmem>>, vector<3x64xf32>,
    %c0_22 = arith.constant 0 : index
    %c0_23 = arith.constant 0 : index
    %50 = vector.load %arg16[%c0_22, %c0_23] : memref<8x64xf32, #tpu.memory_space<vmem>>, vector<8x64xf32>
    %c0_24 = arith.constant 0 : index
    %c0_25 = arith.constant 0 : index
    %51 = vector.load %arg6[%c0_24, %c0_25] : memref<64x34xbf16, #tpu.memory_space<vmem>>, vector<64x34xbf16>
    %52 = arith.truncf %50 : vector<8x64xf32> to vector<8x64xbf16>
    %cst_26 = arith.constant dense<0.000000e+00> : vector<8x34xf32>
    %53 = tpu.matmul %52, %51, %cst_26 {dimension_numbers = #tpu.dot_dimension_numbers<[1], [0], [0], [1], [0, 0, 1, 1], [], []>} : vector<8x64xbf16>, vector<64x34xbf16>, vector<8x34xf32> -> vector<8x34xf32>
    %54 = vector.extract_strided_slice %53 {offsets = [0, 2], sizes = [8, 16], strides = [1, 1]} : vector<8x34xf32> to vector<8x16xf32>
    %c0_27 = arith.constant 0 : index
    %c0_28 = arith.constant 0 : index
    %55 = vector.load %arg20[%c0_27, %c0_28] : memref<8x16xf32, #tpu.memory_space<vmem>>, vector<8x16xf32>
    tpu.vector_store %arg20[%c0_27, %c0_28], %54 {strides = array<i32>} : memref<8x16xf32, #tpu.memory_space<vmem>>, vector<8x16xf32>,
    %56 = vector.extract_strided_slice %53 {offsets = [0, 18], sizes = [8, 16], strides = [1, 1]} : vector<8x34xf32> to vector<8x16xf32>
    %c0_29 = arith.constant 0 : index
    %c0_30 = arith.constant 0 : index
    %57 = vector.load %arg21[%c0_29, %c0_30] : memref<8x16xf32, #tpu.memory_space<vmem>>, vector<8x16xf32>
    tpu.vector_store %arg21[%c0_29, %c0_30], %56 {strides = array<i32>} : memref<8x16xf32, #tpu.memory_space<vmem>>, vector<8x16xf32>,
    %58 = vector.extract_strided_slice %53 {offsets = [0, 0], sizes = [8, 2], strides = [1, 1]} : vector<8x34xf32> to vector<8x2xf32>
    %c0_31 = arith.constant 0 : index
    %c0_32 = arith.constant 0 : index
    %59 = vector.load %arg7[%c0_31, %c0_32] : memref<2x64xbf16, #tpu.memory_space<vmem>>, vector<2x64xbf16>
    %60 = arith.truncf %58 : vector<8x2xf32> to vector<8x2xbf16>
    %cst_33 = arith.constant dense<0.000000e+00> : vector<8x64xf32>
    %61 = tpu.matmul %60, %59, %cst_33 {dimension_numbers = #tpu.dot_dimension_numbers<[1], [0], [0], [1], [0, 0, 1, 1], [], []>} : vector<8x2xbf16>, vector<2x64xbf16>, vector<8x64xf32> -> vector<8x64xf32>
    %c0_34 = arith.constant 0 : index
    %c0_35 = arith.constant 0 : index
    %62 = vector.load %arg8[%c0_34, %c0_35] : memref<1x64xf32, #tpu.memory_space<vmem>>, vector<1x64xf32>
    %63 = vector.broadcast %62 : vector<1x64xf32> to vector<8x64xf32>
    %64 = arith.addf %61, %63 : vector<8x64xf32>
    %cst_36 = arith.constant 2.000000e+01 : f32
    %65 = vector.broadcast %cst_36 : f32 to vector<8x64xf32>
    %66 = arith.cmpf ogt, %64, %65 : vector<8x64xf32>
    %cst_37 = arith.constant 2.000000e+01 : f32
    %67 = vector.broadcast %cst_37 : f32 to vector<8x64xf32>
    %68 = arith.minimumf %64, %67 : vector<8x64xf32>
    %69 = math.exp %68 : vector<8x64xf32>
    %70 = math.log1p %69 : vector<8x64xf32>
    %71 = arith.select %66, %64, %70 : vector<8x64xi1>, vector<8x64xf32>
    %c0_38 = arith.constant 0 : index
    %c0_39 = arith.constant 0 : index
    %72 = vector.load %arg17[%c0_38, %c0_39] : memref<8x64xf32, #tpu.memory_space<vmem>>, vector<8x64xf32>
    tpu.vector_store %arg17[%c0_38, %c0_39], %71 {strides = array<i32>} : memref<8x64xf32, #tpu.memory_space<vmem>>, vector<8x64xf32>,
    %c0_40 = arith.constant 0 : index
    %c0_41 = arith.constant 0 : index
    %73 = vector.load %arg9[%c0_40, %c0_41] : memref<16x64xf32, #tpu.memory_space<vmem>>, vector<16x64xf32>
    %c0_42 = arith.constant 0 : index
    %c0_43 = arith.constant 0 : index
    %c0_44 = arith.constant 0 : index
    %74 = vector.load %arg14[%c0_42, %c0_43, %c0_44] : memref<1x16x64xf32, #tpu.memory_space<vmem>>, vector<1x16x64xf32>
    %75 = vector.shape_cast %74 : vector<1x16x64xf32> to vector<16x64xf32>
    %c0_i32_45 = arith.constant 0 : i32
    %c8_i32 = arith.constant 8 : i32
    %76 = arith.muli %c0_i32_45, %c8_i32 : i32
    %77 = tpu.assume_multiple %76, 8 : i32
    %78 = arith.index_cast %77 : i32 to index
    %c0_46 = arith.constant 0 : index
    %79 = vector.load %arg17[%78, %c0_46] : memref<8x64xf32, #tpu.memory_space<vmem>>, vector<8x64xf32>
    %80 = arith.index_cast %77 : i32 to index
    %c0_47 = arith.constant 0 : index
    %81 = vector.load %arg16[%80, %c0_47] : memref<8x64xf32, #tpu.memory_space<vmem>>, vector<8x64xf32>
    %82 = arith.index_cast %77 : i32 to index
    %c0_48 = arith.constant 0 : index
    %83 = vector.load %arg20[%82, %c0_48] : memref<8x16xf32, #tpu.memory_space<vmem>>, vector<8x16xf32>
    %84 = tpu.transpose %83, [1, 0] : vector<8x16xf32> -> vector<16x8xf32>
    %85 = arith.index_cast %77 : i32 to index
    %c0_49 = arith.constant 0 : index
    %86 = vector.load %arg21[%85, %c0_49] : memref<8x16xf32, #tpu.memory_space<vmem>>, vector<8x16xf32>
    %87 = vector.extract_strided_slice %79 {offsets = [0, 0], sizes = [1, 64], strides = [1, 1]} : vector<8x64xf32> to vector<1x64xf32>
    %88 = vector.extract_strided_slice %81 {offsets = [0, 0], sizes = [1, 64], strides = [1, 1]} : vector<8x64xf32> to vector<1x64xf32>
    %89 = arith.mulf %87, %88 : vector<1x64xf32>
    %90 = vector.broadcast %87 : vector<1x64xf32> to vector<16x64xf32>
    %91 = arith.mulf %90, %73 : vector<16x64xf32>
    %92 = math.exp %91 : vector<16x64xf32>
    %93 = arith.mulf %92, %75 : vector<16x64xf32>
    %94 = vector.extract_strided_slice %84 {offsets = [0, 0], sizes = [16, 1], strides = [1, 1]} : vector<16x8xf32> to vector<16x1xf32>
    %95 = vector.broadcast %94 : vector<16x1xf32> to vector<16x64xf32>
    %96 = vector.broadcast %89 : vector<1x64xf32> to vector<16x64xf32>
    %97 = arith.mulf %95, %96 : vector<16x64xf32>
    %98 = arith.addf %93, %97 : vector<16x64xf32>
    %99 = vector.extract_strided_slice %86 {offsets = [0, 0], sizes = [1, 16], strides = [1, 1]} : vector<8x16xf32> to vector<1x16xf32>
    %cst_50 = arith.constant dense<0.000000e+00> : vector<1x64xf32>
    %100 = tpu.matmul %99, %98, %cst_50 {dimension_numbers = #tpu.dot_dimension_numbers<[1], [0], [0], [1], [0, 0, 1, 1], [], []>} : vector<1x16xf32>, vector<16x64xf32>, vector<1x64xf32> -> vector<1x64xf32>
    %101 = vector.extract_strided_slice %79 {offsets = [1, 0], sizes = [1, 64], strides = [1, 1]} : vector<8x64xf32> to vector<1x64xf32>
    %102 = vector.extract_strided_slice %81 {offsets = [1, 0], sizes = [1, 64], strides = [1, 1]} : vector<8x64xf32> to vector<1x64xf32>
    %103 = arith.mulf %101, %102 : vector<1x64xf32>
    %104 = vector.broadcast %101 : vector<1x64xf32> to vector<16x64xf32>
    %105 = arith.mulf %104, %73 : vector<16x64xf32>
    %106 = math.exp %105 : vector<16x64xf32>
    %107 = arith.mulf %106, %98 : vector<16x64xf32>
    %108 = vector.extract_strided_slice %84 {offsets = [0, 1], sizes = [16, 1], strides = [1, 1]} : vector<16x8xf32> to vector<16x1xf32>
    %109 = vector.broadcast %108 : vector<16x1xf32> to vector<16x64xf32>
    %110 = vector.broadcast %103 : vector<1x64xf32> to vector<16x64xf32>
    %111 = arith.mulf %109, %110 : vector<16x64xf32>
    %112 = arith.addf %107, %111 : vector<16x64xf32>
    %113 = vector.extract_strided_slice %86 {offsets = [1, 0], sizes = [1, 16], strides = [1, 1]} : vector<8x16xf32> to vector<1x16xf32>
    %cst_51 = arith.constant dense<0.000000e+00> : vector<1x64xf32>
    %114 = tpu.matmul %113, %112, %cst_51 {dimension_numbers = #tpu.dot_dimension_numbers<[1], [0], [0], [1], [0, 0, 1, 1], [], []>} : vector<1x16xf32>, vector<16x64xf32>, vector<1x64xf32> -> vector<1x64xf32>
    %115 = vector.extract_strided_slice %79 {offsets = [2, 0], sizes = [1, 64], strides = [1, 1]} : vector<8x64xf32> to vector<1x64xf32>
    %116 = vector.extract_strided_slice %81 {offsets = [2, 0], sizes = [1, 64], strides = [1, 1]} : vector<8x64xf32> to vector<1x64xf32>
    %117 = arith.mulf %115, %116 : vector<1x64xf32>
    %118 = vector.broadcast %115 : vector<1x64xf32> to vector<16x64xf32>
    %119 = arith.mulf %118, %73 : vector<16x64xf32>
    %120 = math.exp %119 : vector<16x64xf32>
    %121 = arith.mulf %120, %112 : vector<16x64xf32>
    %122 = vector.extract_strided_slice %84 {offsets = [0, 2], sizes = [16, 1], strides = [1, 1]} : vector<16x8xf32> to vector<16x1xf32>
    %123 = vector.broadcast %122 : vector<16x1xf32> to vector<16x64xf32>
    %124 = vector.broadcast %117 : vector<1x64xf32> to vector<16x64xf32>
    %125 = arith.mulf %123, %124 : vector<16x64xf32>
    %126 = arith.addf %121, %125 : vector<16x64xf32>
    %127 = vector.extract_strided_slice %86 {offsets = [2, 0], sizes = [1, 16], strides = [1, 1]} : vector<8x16xf32> to vector<1x16xf32>
    %cst_52 = arith.constant dense<0.000000e+00> : vector<1x64xf32>
    %128 = tpu.matmul %127, %126, %cst_52 {dimension_numbers = #tpu.dot_dimension_numbers<[1], [0], [0], [1], [0, 0, 1, 1], [], []>} : vector<1x16xf32>, vector<16x64xf32>, vector<1x64xf32> -> vector<1x64xf32>
    %129 = vector.extract_strided_slice %79 {offsets = [3, 0], sizes = [1, 64], strides = [1, 1]} : vector<8x64xf32> to vector<1x64xf32>
    %130 = vector.extract_strided_slice %81 {offsets = [3, 0], sizes = [1, 64], strides = [1, 1]} : vector<8x64xf32> to vector<1x64xf32>
    %131 = arith.mulf %129, %130 : vector<1x64xf32>
    %132 = vector.broadcast %129 : vector<1x64xf32> to vector<16x64xf32>
    %133 = arith.mulf %132, %73 : vector<16x64xf32>
    %134 = math.exp %133 : vector<16x64xf32>
    %135 = arith.mulf %134, %126 : vector<16x64xf32>
    %136 = vector.extract_strided_slice %84 {offsets = [0, 3], sizes = [16, 1], strides = [1, 1]} : vector<16x8xf32> to vector<16x1xf32>
    %137 = vector.broadcast %136 : vector<16x1xf32> to vector<16x64xf32>
    %138 = vector.broadcast %131 : vector<1x64xf32> to vector<16x64xf32>
    %139 = arith.mulf %137, %138 : vector<16x64xf32>
    %140 = arith.addf %135, %139 : vector<16x64xf32>
    %141 = vector.extract_strided_slice %86 {offsets = [3, 0], sizes = [1, 16], strides = [1, 1]} : vector<8x16xf32> to vector<1x16xf32>
    %cst_53 = arith.constant dense<0.000000e+00> : vector<1x64xf32>
    %142 = tpu.matmul %141, %140, %cst_53 {dimension_numbers = #tpu.dot_dimension_numbers<[1], [0], [0], [1], [0, 0, 1, 1], [], []>} : vector<1x16xf32>, vector<16x64xf32>, vector<1x64xf32> -> vector<1x64xf32>
    %143 = vector.extract_strided_slice %79 {offsets = [4, 0], sizes = [1, 64], strides = [1, 1]} : vector<8x64xf32> to vector<1x64xf32>
    %144 = vector.extract_strided_slice %81 {offsets = [4, 0], sizes = [1, 64], strides = [1, 1]} : vector<8x64xf32> to vector<1x64xf32>
    %145 = arith.mulf %143, %144 : vector<1x64xf32>
    %146 = vector.broadcast %143 : vector<1x64xf32> to vector<16x64xf32>
    %147 = arith.mulf %146, %73 : vector<16x64xf32>
    %148 = math.exp %147 : vector<16x64xf32>
    %149 = arith.mulf %148, %140 : vector<16x64xf32>
    %150 = vector.extract_strided_slice %84 {offsets = [0, 4], sizes = [16, 1], strides = [1, 1]} : vector<16x8xf32> to vector<16x1xf32>
    %151 = vector.broadcast %150 : vector<16x1xf32> to vector<16x64xf32>
    %152 = vector.broadcast %145 : vector<1x64xf32> to vector<16x64xf32>
    %153 = arith.mulf %151, %152 : vector<16x64xf32>
    %154 = arith.addf %149, %153 : vector<16x64xf32>
    %155 = vector.extract_strided_slice %86 {offsets = [4, 0], sizes = [1, 16], strides = [1, 1]} : vector<8x16xf32> to vector<1x16xf32>
    %cst_54 = arith.constant dense<0.000000e+00> : vector<1x64xf32>
    %156 = tpu.matmul %155, %154, %cst_54 {dimension_numbers = #tpu.dot_dimension_numbers<[1], [0], [0], [1], [0, 0, 1, 1], [], []>} : vector<1x16xf32>, vector<16x64xf32>, vector<1x64xf32> -> vector<1x64xf32>
    %157 = vector.extract_strided_slice %79 {offsets = [5, 0], sizes = [1, 64], strides = [1, 1]} : vector<8x64xf32> to vector<1x64xf32>
    %158 = vector.extract_strided_slice %81 {offsets = [5, 0], sizes = [1, 64], strides = [1, 1]} : vector<8x64xf32> to vector<1x64xf32>
    %159 = arith.mulf %157, %158 : vector<1x64xf32>
    %160 = vector.broadcast %157 : vector<1x64xf32> to vector<16x64xf32>
    %161 = arith.mulf %160, %73 : vector<16x64xf32>
    %162 = math.exp %161 : vector<16x64xf32>
    %163 = arith.mulf %162, %154 : vector<16x64xf32>
    %164 = vector.extract_strided_slice %84 {offsets = [0, 5], sizes = [16, 1], strides = [1, 1]} : vector<16x8xf32> to vector<16x1xf32>
    %165 = vector.broadcast %164 : vector<16x1xf32> to vector<16x64xf32>
    %166 = vector.broadcast %159 : vector<1x64xf32> to vector<16x64xf32>
    %167 = arith.mulf %165, %166 : vector<16x64xf32>
    %168 = arith.addf %163, %167 : vector<16x64xf32>
    %169 = vector.extract_strided_slice %86 {offsets = [5, 0], sizes = [1, 16], strides = [1, 1]} : vector<8x16xf32> to vector<1x16xf32>
    %cst_55 = arith.constant dense<0.000000e+00> : vector<1x64xf32>
    %170 = tpu.matmul %169, %168, %cst_55 {dimension_numbers = #tpu.dot_dimension_numbers<[1], [0], [0], [1], [0, 0, 1, 1], [], []>} : vector<1x16xf32>, vector<16x64xf32>, vector<1x64xf32> -> vector<1x64xf32>
    %171 = vector.extract_strided_slice %79 {offsets = [6, 0], sizes = [1, 64], strides = [1, 1]} : vector<8x64xf32> to vector<1x64xf32>
    %172 = vector.extract_strided_slice %81 {offsets = [6, 0], sizes = [1, 64], strides = [1, 1]} : vector<8x64xf32> to vector<1x64xf32>
    %173 = arith.mulf %171, %172 : vector<1x64xf32>
    %174 = vector.broadcast %171 : vector<1x64xf32> to vector<16x64xf32>
    %175 = arith.mulf %174, %73 : vector<16x64xf32>
    %176 = math.exp %175 : vector<16x64xf32>
    %177 = arith.mulf %176, %168 : vector<16x64xf32>
    %178 = vector.extract_strided_slice %84 {offsets = [0, 6], sizes = [16, 1], strides = [1, 1]} : vector<16x8xf32> to vector<16x1xf32>
    %179 = vector.broadcast %178 : vector<16x1xf32> to vector<16x64xf32>
    %180 = vector.broadcast %173 : vector<1x64xf32> to vector<16x64xf32>
    %181 = arith.mulf %179, %180 : vector<16x64xf32>
    %182 = arith.addf %177, %181 : vector<16x64xf32>
    %183 = vector.extract_strided_slice %86 {offsets = [6, 0], sizes = [1, 16], strides = [1, 1]} : vector<8x16xf32> to vector<1x16xf32>
    %cst_56 = arith.constant dense<0.000000e+00> : vector<1x64xf32>
    %184 = tpu.matmul %183, %182, %cst_56 {dimension_numbers = #tpu.dot_dimension_numbers<[1], [0], [0], [1], [0, 0, 1, 1], [], []>} : vector<1x16xf32>, vector<16x64xf32>, vector<1x64xf32> -> vector<1x64xf32>
    %185 = vector.extract_strided_slice %79 {offsets = [7, 0], sizes = [1, 64], strides = [1, 1]} : vector<8x64xf32> to vector<1x64xf32>
    %186 = vector.extract_strided_slice %81 {offsets = [7, 0], sizes = [1, 64], strides = [1, 1]} : vector<8x64xf32> to vector<1x64xf32>
    %187 = arith.mulf %185, %186 : vector<1x64xf32>
    %188 = vector.broadcast %185 : vector<1x64xf32> to vector<16x64xf32>
    %189 = arith.mulf %188, %73 : vector<16x64xf32>
    %190 = math.exp %189 : vector<16x64xf32>
    %191 = arith.mulf %190, %182 : vector<16x64xf32>
    %192 = vector.extract_strided_slice %84 {offsets = [0, 7], sizes = [16, 1], strides = [1, 1]} : vector<16x8xf32> to vector<16x1xf32>
    %193 = vector.broadcast %192 : vector<16x1xf32> to vector<16x64xf32>
    %194 = vector.broadcast %187 : vector<1x64xf32> to vector<16x64xf32>
    %195 = arith.mulf %193, %194 : vector<16x64xf32>
    %196 = arith.addf %191, %195 : vector<16x64xf32>
    %197 = vector.extract_strided_slice %86 {offsets = [7, 0], sizes = [1, 16], strides = [1, 1]} : vector<8x16xf32> to vector<1x16xf32>
    %cst_57 = arith.constant dense<0.000000e+00> : vector<1x64xf32>
    %198 = tpu.matmul %197, %196, %cst_57 {dimension_numbers = #tpu.dot_dimension_numbers<[1], [0], [0], [1], [0, 0, 1, 1], [], []>} : vector<1x16xf32>, vector<16x64xf32>, vector<1x64xf32> -> vector<1x64xf32>
    %199 = tpu.concatenate %100, %114, %128, %142, %156, %170, %184, %198 in 0 : vector<1x64xf32>, vector<1x64xf32>, vector<1x64xf32>, vector<1x64xf32>, vector<1x64xf32>, vector<1x64xf32>, vector<1x64xf32>, vector<1x64xf32> -> vector<8x64xf32>
    %200 = arith.index_cast %77 : i32 to index
    %c0_58 = arith.constant 0 : index
    %201 = vector.load %arg19[%200, %c0_58] : memref<8x64xf32, #tpu.memory_space<vmem>>, vector<8x64xf32>
    tpu.vector_store %arg19[%200, %c0_58], %199 {strides = array<i32>} : memref<8x64xf32, #tpu.memory_space<vmem>>, vector<8x64xf32>,
    %c1_i32 = arith.constant 1 : i32
    %c0_59 = arith.constant 0 : index
    %c0_60 = arith.constant 0 : index
    %c0_61 = arith.constant 0 : index
    %202 = vector.load %arg14[%c0_59, %c0_60, %c0_61] : memref<1x16x64xf32, #tpu.memory_space<vmem>>, vector<1x16x64xf32>
    %203 = vector.shape_cast %202 : vector<1x16x64xf32> to vector<16x64xf32>
    %204 = vector.shape_cast %196 : vector<16x64xf32> to vector<1x16x64xf32>
    tpu.vector_store %arg14[%c0_59, %c0_60, %c0_61], %204 {strides = array<i32>} : memref<1x16x64xf32, #tpu.memory_space<vmem>>, vector<1x16x64xf32>,
    %c0_62 = arith.constant 0 : index
    %c0_63 = arith.constant 0 : index
    %205 = vector.load %arg19[%c0_62, %c0_63] : memref<8x64xf32, #tpu.memory_space<vmem>>, vector<8x64xf32>
    %c0_64 = arith.constant 0 : index
    %c0_65 = arith.constant 0 : index
    %206 = vector.load %arg16[%c0_64, %c0_65] : memref<8x64xf32, #tpu.memory_space<vmem>>, vector<8x64xf32>
    %c0_66 = arith.constant 0 : index
    %c0_67 = arith.constant 0 : index
    %207 = vector.load %arg10[%c0_66, %c0_67] : memref<1x64xf32, #tpu.memory_space<vmem>>, vector<1x64xf32>
    %208 = vector.broadcast %207 : vector<1x64xf32> to vector<8x64xf32>
    %209 = arith.mulf %206, %208 : vector<8x64xf32>
    %210 = arith.addf %205, %209 : vector<8x64xf32>
    %c0_68 = arith.constant 0 : index
    %c0_69 = arith.constant 0 : index
    %211 = vector.load %arg18[%c0_68, %c0_69] : memref<8x64xf32, #tpu.memory_space<vmem>>, vector<8x64xf32>
    %212 = arith.mulf %210, %211 : vector<8x64xf32>
    %c0_70 = arith.constant 0 : index
    %c0_71 = arith.constant 0 : index
    %213 = vector.load %arg11[%c0_70, %c0_71] : memref<64x32xbf16, #tpu.memory_space<vmem>>, vector<64x32xbf16>
    %214 = arith.truncf %212 : vector<8x64xf32> to vector<8x64xbf16>
    %cst_72 = arith.constant dense<0.000000e+00> : vector<8x32xf32>
    %215 = tpu.matmul %214, %213, %cst_72 {dimension_numbers = #tpu.dot_dimension_numbers<[1], [0], [0], [1], [0, 0, 1, 1], [], []>} : vector<8x64xbf16>, vector<64x32xbf16>, vector<8x32xf32> -> vector<8x32xf32>
    %c0_73 = arith.constant 0 : index
    %c0_74 = arith.constant 0 : index
    %c0_75 = arith.constant 0 : index
    %216 = vector.load %arg12[%c0_73, %c0_74, %c0_75] : memref<1x8x32xf32, #tpu.memory_space<vmem>>, vector<1x8x32xf32>
    %217 = vector.shape_cast %216 : vector<1x8x32xf32> to vector<8x32xf32>
    %218 = vector.shape_cast %215 : vector<8x32xf32> to vector<1x8x32xf32>
    tpu.vector_store %arg12[%c0_73, %c0_74, %c0_75], %218 {strides = array<i32>} : memref<1x8x32xf32, #tpu.memory_space<vmem>>, vector<1x8x32xf32>,
    %c5 = arith.constant 5 : index
    %c0_76 = arith.constant 0 : index
    %219 = vector.load %arg16[%c5, %c0_76] : memref<8x64xf32, #tpu.memory_space<vmem>>, vector<3x64xf32>
    %c0_77 = arith.constant 0 : index
    %c0_78 = arith.constant 0 : index
    %c0_79 = arith.constant 0 : index
    %220 = vector.load %arg13[%c0_77, %c0_78, %c0_79] : memref<1x3x64xf32, #tpu.memory_space<vmem>>, vector<1x3x64xf32>
    %221 = vector.shape_cast %220 : vector<1x3x64xf32> to vector<3x64xf32>
    %222 = vector.shape_cast %219 : vector<3x64xf32> to vector<1x3x64xf32>
    tpu.vector_store %arg13[%c0_77, %c0_78, %c0_79], %222 {strides = array<i32>} : memref<1x3x64xf32, #tpu.memory_space<vmem>>, vector<1x3x64xf32>,
    return
  }
  func.func @transform_0(%arg0: i32, %arg1: i32) -> (i32, i32, i32) {
    %c0_i32 = arith.constant 0 : i32
    %c0_i32_0 = arith.constant 0 : i32
    return %arg0, %arg1, %c0_i32 : i32, i32, i32
  }
  func.func @transform_1(%arg0: i32, %arg1: i32) -> (i32, i32) {
    %c0_i32 = arith.constant 0 : i32
    %c0_i32_0 = arith.constant 0 : i32
    %c0_i32_1 = arith.constant 0 : i32
    return %c0_i32, %c0_i32_0 : i32, i32
  }
  func.func @transform_2(%arg0: i32, %arg1: i32) -> (i32, i32) {
    %c0_i32 = arith.constant 0 : i32
    %c0_i32_0 = arith.constant 0 : i32
    %c0_i32_1 = arith.constant 0 : i32
    return %c0_i32, %c0_i32_0 : i32, i32
  }
  func.func @transform_3(%arg0: i32, %arg1: i32) -> (i32, i32) {
    %c0_i32 = arith.constant 0 : i32
    %c0_i32_0 = arith.constant 0 : i32
    %c0_i32_1 = arith.constant 0 : i32
    return %c0_i32, %c0_i32_0 : i32, i32
  }
  func.func @transform_4(%arg0: i32, %arg1: i32) -> (i32, i32) {
    %c0_i32 = arith.constant 0 : i32
    %c0_i32_0 = arith.constant 0 : i32
    %c0_i32_1 = arith.constant 0 : i32
    return %c0_i32, %c0_i32_0 : i32, i32
  }
  func.func @transform_5(%arg0: i32, %arg1: i32) -> (i32, i32) {
    %c0_i32 = arith.constant 0 : i32
    %c0_i32_0 = arith.constant 0 : i32
    %c0_i32_1 = arith.constant 0 : i32
    return %c0_i32, %c0_i32_0 : i32, i32
  }
  func.func @transform_6(%arg0: i32, %arg1: i32) -> (i32, i32) {
    %c0_i32 = arith.constant 0 : i32
    %c0_i32_0 = arith.constant 0 : i32
    %c0_i32_1 = arith.constant 0 : i32
    return %c0_i32, %c0_i32_0 : i32, i32
  }
  func.func @transform_7(%arg0: i32, %arg1: i32) -> (i32, i32) {
    %c0_i32 = arith.constant 0 : i32
    %c0_i32_0 = arith.constant 0 : i32
    %c0_i32_1 = arith.constant 0 : i32
    return %c0_i32, %c0_i32_0 : i32, i32
  }
  func.func @transform_8(%arg0: i32, %arg1: i32) -> (i32, i32) {
    %c0_i32 = arith.constant 0 : i32
    %c0_i32_0 = arith.constant 0 : i32
    %c0_i32_1 = arith.constant 0 : i32
    return %c0_i32, %c0_i32_0 : i32, i32
  }
  func.func @transform_9(%arg0: i32, %arg1: i32) -> (i32, i32) {
    %c0_i32 = arith.constant 0 : i32
    %c0_i32_0 = arith.constant 0 : i32
    %c0_i32_1 = arith.constant 0 : i32
    return %c0_i32, %c0_i32_0 : i32, i32
  }
  func.func @transform_10(%arg0: i32, %arg1: i32) -> (i32, i32, i32) {
    %c0_i32 = arith.constant 0 : i32
    %c0_i32_0 = arith.constant 0 : i32
    return %arg0, %arg1, %c0_i32 : i32, i32, i32
  }
  func.func @transform_11(%arg0: i32, %arg1: i32) -> (i32, i32, i32) {
    %c0_i32 = arith.constant 0 : i32
    %c0_i32_0 = arith.constant 0 : i32
    %c0_i32_1 = arith.constant 0 : i32
    return %arg0, %c0_i32, %c0_i32_0 : i32, i32, i32
  }
  func.func @transform_12(%arg0: i32, %arg1: i32) -> (i32, i32, i32) {
    %c0_i32 = arith.constant 0 : i32
    %c0_i32_0 = arith.constant 0 : i32
    %c0_i32_1 = arith.constant 0 : i32
    return %arg0, %c0_i32, %c0_i32_0 : i32, i32, i32
  }
}

</mosaic_0001>

<bundles_post_ra>
// kernel: tpu_custom_call.1
= control target key start
LH: loop header
LB: loop body
LE: loop exit
PB: predicated region body
PF: predicated region fallthrough
CT: control target
= control target key end

     0   :  { %s2850_s0 = inlined_call_operand.vmem [shape: f32[2,8,32], index: 0, kind: input, shape index: {}]   ;;  %s2851_s1 = inlined_call_operand.vmem [shape: bf16[32,128], index: 1, kind: input, shape index: {}]   ;;  %s2852_s2 = inlined_call_operand.vmem [shape: f32[4,64], index: 2, kind: input, shape index: {}]   ;;  %s2853_s3 = inlined_call_operand.vmem [shape: f32[1,64], index: 3, kind: input, shape index: {}]   ;;  %s2854_s4 = inlined_call_operand.vmem [shape: bf16[64,34], index: 4, kind: input, shape index: {}]   ;;  %s2855_s5 = inlined_call_operand.vmem [shape: bf16[2,64], index: 5, kind: input, shape index: {}]   ;;  %s2856_s6 = inlined_call_operand.vmem [shape: f32[1,64], index: 6, kind: input, shape index: {}]   ;;  %s2857_s7 = inlined_call_operand.vmem [shape: f32[16,64], index: 7, kind: input, shape index: {}]   ;;  %s2858_s8 = inlined_call_operand.vmem [shape: f32[1,64], index: 8, kind: input, shape index: {}]   ;;  %s2859_s9 = inlined_call_operand.vmem [shape: bf16[64,32], index: 9, kind: input, shape index: {}]   ;;  %s2860_s10 = inlined_call_operand.hbm [shape: f32[2,8,32], index: 10, kind: output, shape index: {0}]   ;;  %s2861_s11 = inlined_call_operand.vmem [shape: f32[2,3,64], index: 11, kind: output, shape index: {1}]   ;;  %s2862_s12 = inlined_call_operand.hbm [shape: f32[2,16,64], index: 12, kind: output, shape index: {2}]  }
   0x1   :  { %2863 = sst [smem:[#allocation15_spill]] %s2850_s0 }
   0x2   :  { %2864 = sst [smem:[#allocation16_spill]] %s2851_s1 }
   0x3   :  { %2865 = sst [smem:[#allocation17_spill]] %s2852_s2 }
   0x4   :  { %2866 = sst [smem:[#allocation18_spill]] %s2853_s3 }
   0x5   :  { %2867 = sst [smem:[#allocation19_spill]] %s2854_s4 }
   0x6   :  { %2868 = sst [smem:[#allocation20_spill]] %s2855_s5 }
   0x7   :  { %18 = vsyncpa [#allocation10], 0 }
   0x8   :  { %20 = vsyncpa [#allocation10 + $0x1], 0 }
   0x9   :  { %21 = vsyncpa [#allocation12], 0 }
   0xa   :  { %23 = vsyncpa [#allocation12 + $0x1], 0  ;;  %s2436_s21 = smov 0   ;;  %s2438_s22 = smov 0  }
   0xb   :  { %s2440_s23 = smov 0   ;;  %s2442_s24 = smov 0  }
   0xc   :  { %s2444_s25 = smov 0   ;;  %s2446_s26 = smov 0  }
   0xd LB: > { %s1920_s27 = sadd.s32 4294967295, %s2352_s26   ;;  %s1921_s28 = sadd.s32 4294967294, %s2352_s26   ;;  %s2352_s26 = sphi %s2446_s26, %s29_s26   ;;  %s2348_s25 = sphi %s2444_s25, %s2882_s25   ;;  %s2344_s24 = sphi %s2442_s24, %s2881_s24   ;;  %s2340_s23 = sphi %s2440_s23, %s2880_s23   ;;  %s2336_s22 = sphi %s2438_s22, %s2879_s22   ;;  %s2332_s21 = sphi %s2436_s21, %s2878_s21  }
   0xe   : > { %s41_s29 = sadd.s32 1, %s2348_s25  ;;  %s267_s30 = sadd.s32 1, %s2340_s23 }
   0xf   : > { %p43_p0 = scmp.ge.s32.totalorder %s41_s29, 2  ;;  %p277_p1 = scmp.ne.s32.totalorder %s2340_s23, %s2336_s22 }
  0x10   : > { %p278_p2 = scmp.eq.s32.totalorder %s1920_s27, 1  ;;  %p283_p3 = scmp.ne.s32.totalorder %s2336_s22, %s2332_s21 }
  0x11   : > { %s2884_s29 = smov (%p43_p0, %s41_s29), 0  ;;  %p284_p5 = scmp.eq.s32.totalorder %s1921_s28, 1 }
  0x12   : > { %p2476_p4 = por %p278_p2, %p277_p1  ;;  %s262_s14 = ssub.s32 %s2348_s25, %s2884_s29 }
  0x13   : > { %p1924_p6 = scmp.ge.s32.totalorder %s2352_s26, 1  ;;  %p265_p7 = scmp.eq.s32.totalorder %s262_s14, 0 }
  0x14   : > { %p2483_p8 = por %p284_p5, %p283_p3  ;;  %p391_p9 = scmp.lt.s32.totalorder %s2352_s26, 3 }
  0x15   : > { %s2489_s16 = scalar_select %p265_p7, %s2340_s23, %s267_s30  }
  0x16   : > { %p392_p10 = pnand %p1924_p6, %p391_p9 }
  0x17   : > { %s2871_s1 = sld [smem:[#allocation16_spill]] (!%p392_p10)  ;;  %p444_p11 = scmp.lt.s32.totalorder (!%p392_p10), %s2344_s24, 1 }
  0x18   : > { %395 = sbr.rel (%p392_p10) target bundleno = 1353 (0x549), region = 60  ;;  %s2872_s0 = sld [smem:[#allocation15_spill]] (!%p392_p10) }
  0x19   : > { %s2873_s4 = sld [smem:[#allocation19_spill]] (!%p392_p10)  ;;  %s1967_s20 = sshll.u32 (!%p392_p10), %s2344_s24, 8 }
  0x1a   : > { %s2874_s2 = sld [smem:[#allocation17_spill]] (!%p392_p10) }
  0x1b   : > { %s2875_s3 = sld [smem:[#allocation18_spill]] (!%p392_p10) }
  0x1c   : > { %s2876_s5 = sld [smem:[#allocation20_spill]] (!%p392_p10) }
  0x1d   : > { %v2192_v0 = vld [vmem:[%s2871_s1 + $0x8] sm:$0xff]   ;;  %v2354_v1 = vmov 0.0   ;;  %v2193_v2 = vld [vmem:[%s2871_s1] sm:$0xff]   ;;  %vm2355_vm0 = vmmov 0   ;;  %vm460_vm1 = vcmask 518144   ;;  %s2508_s27 = scalar_select %p444_p11, %s2344_s24, 1 }
  0x1e   : > { %2007 = vmatprep.subr.bf16.mxu1 %v2354_v1  ;;  %2027 = vmatprep.subr.bf16.mxu0 %v2354_v1  ;;  %461 = vst.msk [vmem:[#allocation2] sm:$0x7] %vm460_vm1, %v2354_v1  ;;  %vm483_vm2 = vcmask 261120   ;;  %vm544_vm3 = vcmask 1042432   ;;  %vm569_vm4 = vcmask 1046528   ;;  %vm584_vm5 = vcmask 1045504  }
  0x1f   : > { %2008 = vmatpush3.bf16.msra.mxu1 %v2192_v0  ;;  %2011 = vmatprep.mubr.msk.bf16.mxu1 %vm2355_vm0, %v2354_v1  ;;  %s1927_s28 = sshll.u32 %s2508_s27, 3  ;;  %v2194_v5 = vld [vmem:[%s2873_s4 + $0x18] sm:$0xff]   ;;  %v2195_v6 = vld [vmem:[%s2873_s4 + $0x10] sm:$0xff]   ;;  %v2196_v7 = vld [vmem:[%s2873_s4 + $0x8] sm:$0xff]   ;;  %vm599_vm6 = vcmask 1044480   ;;  %vm462_vm7 = vcmask 523264  }
  0x20   : > { %2009 = vmatprep.subr.bf16.mxu1 %v2354_v1  ;;  %2029 = vmatprep.mubr.msk.bf16.mxu0 %vm2355_vm0, %v2354_v1  ;;  %s450_s17 = scalar_lea.vmem %s2872_s0, %s1927_s28  ;;  %v2197_v8 = vld [vmem:[%s2873_s4] sm:$0xff]   ;;  %s1928_s0 = sshll.u32 %s2508_s27, 2  ;;  %vm715_vm8 = vcmask 1040384   ;;  %vm711_vm9 = vcmask 15360   ;;  %v2357_v56 = vmov 0   ;;  %vm696_vm10 = vcmask 130048  }
  0x21   : > { %v465_v3 = vld [vmem:[%s450_s17] sm:$0xff]  ;;  %s454_s30 = scalar_lea.vmem %s2861_s11, %s1928_s0  ;;  %s2356_s27 = smov 126   ;;  %2176 = vset.pattern.permute.xlu1 %v2357_v56  ;;  %v2359_v59 = vmov 7   ;;  %vm1647_vm13 = vcmask 1041408   ;;  %vm1650_vm14 = vcmask 1043456  }
  0x22   : > { %v470_v4 = vpack.c.bf16 %v465_v3, %v465_v3  ;;  %v1935_v11 = vld [vmem:[%s2874_s2 + $0x1] ss:$0 sm:$0xff]  ;;  %v1936_v12 = vld [vmem:[%s2874_s2 + $0x2] ss:$0 sm:$0xff]  ;;  %v1933_v14 = vld [vmem:[%s2874_s2] ss:$0 sm:$0xff] }
  0x23   : > { %2010 = vmatpush3.bf16.msra.mxu1 %v2193_v2  ;;  %v1937_v15 = vld [vmem:[%s2874_s2 + $0x3] ss:$0 sm:$0xff]  ;;  %v1934_v18 = vld [vmem:[%s2875_s3] ss:$0 sm:$0xff]  ;;  %s2579_s17 = sand.u32 1, %s2336_s22   ;;  %s2358_s0 = smov 110  }
  0x24   : > { %2015 = vmatprep.subr.bf16.mxu1 %v2354_v1  ;;  %v702_v49 = vld [vmem:[%s2876_s5] sm:$0x1]  ;;  %s1926_s18 = sshll.u32 %s2579_s17, 4  ;;  %s2367_s1 = smov [#allocation11]  }
  0x25   : > { %v540_v9 = vld [vmem:[#allocation2] sm:$0x7]  ;;  %v717_v50 = vsel %vm715_vm8, %v702_v49, 0  ;;  %s2582_s19 = scalar_lea.vmem [#allocation11], %s1926_s18  ;;  %s2250_s2 = sshll.u32 %s2367_s1, 4  ;;  %s2251_s2 = int_to_ptr.vmem [resolvable:$false] %s2250_s2 }
  0x26   : > { %2012 = vmatmul.mubr.msk.bf16.vlgmr.msra.gmra.mxu1 %vm483_vm2, %v470_v4  ;;  %2028 = vmatpush3.bf16.msra.mxu0 %v717_v50  ;;  %463 = vst.msk [vmem:[%s2582_s19] sm:$0xff] %vm462_vm7, %v2354_v1  ;;  %464 = vst.msk [vmem:[%s2582_s19 + $0x8] sm:$0xff] %vm462_vm7, %v2354_v1  ;;  %v1944_v60 = vld [vmem:[%s2856_s6] ss:$0 sm:$0xff] }
  0x27   : > { %2023 = vmatprep.mubr.msk.bf16.mxu1 %vm2355_vm0, %v2354_v1  ;;  %2016 = vmatpush3.bf16.msra.mxu1 %v2194_v5 }
  0x28   : > { %2017 = vmatprep.subr.bf16.mxu1 %v2354_v1  ;;  %2033 = vmatprep.subr.mxu0 %v2354_v1 }
  0x2b   : > { %2018 = vmatpush3.bf16.msra.mxu1 %v2195_v6 }
  0x2c   : > { %2019 = vmatprep.subr.bf16.mxu1 %v2354_v1 }
  0x2f   : > { %2020 = vmatpush3.bf16.msra.mxu1 %v2196_v7 }
  0x30   : > { %2021 = vmatprep.subr.bf16.mxu1 %v2354_v1 }
  0x33   : > { %2022 = vmatpush3.bf16.msra.mxu1 %v2197_v8 }
  0x34   : > { %2040 = vmatprep.subr.mxu1 %v2354_v1 }
  0xe6   : > { %v2534_v10 = vpop.f32.mrf.mxu1 }
  0xe7   : > { %v542_v13 = vrot.slane %v2534_v10, 5 }
  0xe8   : > { %v2013_v16 = vpop.f32.mrf.mxu1 }
  0xe9   : > { %v545_v17 = vsel %vm544_vm3, %v540_v9, %v542_v13  ;;  %v566_v19 = vmul.f32 %v1935_v11, %v542_v13  ;;  %v581_v20 = vmul.f32 %v1936_v12, %v542_v13  ;;  %614 = vst.msk [vmem:[#allocation2] sm:$0x7] %vm460_vm1, %v542_v13  ;;  %v596_v27 = vmul.f32 %v1937_v15, %v542_v13 }
  0xea   : > { %v552_v21 = vmul.f32 %v1933_v14, %v545_v17  ;;  %v565_v22 = vmul.f32 %v1935_v11, %v545_v17  ;;  %v580_v23 = vmul.f32 %v1936_v12, %v545_v17  ;;  %v595_v24 = vmul.f32 %v1937_v15, %v545_v17  ;;  %v524_v25 = vpop.f32.mrf.mxu1 }
  0xeb   : > { %v571_v26 = vrot.slane %v566_v19, 1  ;;  %v586_v31 = vrot.slane %v581_v20, 2  ;;  %v601_v35 = vrot.slane %v596_v27, 3  ;;  %v2360_v17 = vmov 1  }
  0xec   : > { %v559_v28 = vadd.f32 %v1934_v18, %v552_v21  ;;  %v570_v29 = vrot.slane %v565_v22, 1  ;;  %v585_v30 = vrot.slane %v580_v23, 2  ;;  %v2014_v32 = vpop.f32.mrf.mxu1  ;;  %v600_v34 = vrot.slane %v595_v24, 3 }
  0xed   : > { %v2361_v18 = vmov 2   ;;  %v2362_v19 = vmov 3   ;;  %v2363_v20 = vmov 4   ;;  %v2364_v21 = vmov 5  }
  0xee   : > { %v572_v33 = vsel %vm569_vm4, %v570_v29, %v571_v26  ;;  %v587_v37 = vsel %vm584_vm5, %v585_v30, %v586_v31  ;;  %v602_v39 = vsel %vm599_vm6, %v600_v34, %v601_v35  ;;  %v2365_v23 = vmov 6   ;;  %v2608_v35 = vld [vmem:[%s2857_s7] sm:$0xff] }
  0xef   : > { %v574_v36 = vadd.f32 %v572_v33, %v559_v28  ;;  %v1932_v25 = vmul.f32 -1.442695, %v2534_v10  ;;  %v815_v30 = vlaneseq }
  0xf1   : > { %v589_v38 = vadd.f32 %v587_v37, %v574_v36  ;;  %v2599_v31 = vshrl.u32 %v815_v30, 7 }
  0xf3   : > { %v604_v40 = vadd.f32 %v602_v39, %v589_v38  ;;  %v817_v32 = vsub.s32 0, %v2599_v31 }
  0xf5   : > { %v1938_v41 = vmul.f32 -1.442695, %v604_v40 }
  0xf7   : > { %2202 = vpow2.f32 %v1938_v41  ;;  %v1021_v41 = vsub.s32 2, %v2599_v31 }
 0x104   : > { %v2203_v42 = vpop.eup %2202 }
 0x105   : > { %v608_v43 = vadd.f32 1.0, %v2203_v42 }
 0x107   : > { %2204 = vrcp.f32 %v608_v43  ;;  %v2618_v43 = vld [vmem:[%s2857_s7 + $0x8] sm:$0xff] }
 0x114   : > { %v2205_v44 = vpop.eup %2204 }
 0x115   : > { %v611_v45 = vmul.f32 %v2205_v44, %v604_v40 }
 0x117   : > { %612 = vst.msk [vmem:[#allocation3] sm:$0xff] %vm462_vm7, %v611_v45 }
 0x11e   : > { %v1748_v46 = vld [vmem:[#allocation3 + $0x5] sm:$0x7] }
 0x11f   : > { %v2562_v47 = vld [vmem:[#allocation3] sm:$0xff]  ;;  %1749 = vst.msk [vmem:[%s454_s30] sm:$0x7] %vm460_vm1, %v1748_v46  ;;  %s2366_s30 = smov 64  }
 0x120   : > { %v624_v48 = vpack.c.bf16 %v2562_v47, %v2562_v47 }
 0x122   : > { %2024 = vmatmul.mubr.msk.bf16.vlgmr.msra.gmra.mxu1 %vm462_vm7, %v624_v48 }
 0x123   : > { %2044 = vmatprep.mubr.msk.f32.mxu1 %vm2355_vm0, %v2354_v1 }
 0x1e2   : > { %v686_v51 = vpop.f32.mrf.mxu1 }
 0x1e3   : > { %v703_v52 = vpack.c.bf16 %v686_v51, %v686_v51  ;;  %693 = vrot.lane.b32.xlu0 %v686_v51, %s2356_s27  ;;  %s2770_s27 = scalar_lea.hbm %s2862_s12, %s1967_s20 }
 0x1e4   : > { %v2025_v53 = vpop.f32.mrf.mxu1 }
 0x1e5   : > { %2030 = vmatmul.mubr.msk.bf16.vlgmr.msra.gmra.mxu0 %vm711_vm9, %v703_v52 }
 0x1e6   : > { %v689_v54 = vpop.f32.mrf.mxu1  ;;  %2037 = vmatprep.mubr.msk.f32.mxu0 %vm2355_vm0, %v2354_v1 }
 0x1e8   : > { %v2026_v55 = vpop.f32.mrf.mxu1 }
 0x255   : > { %v694_v57 = vpop.permute.xlu0 %693 }
 0x256   : > { %697 = vst.msk [vmem:[#allocation7] sm:$0xff] %vm696_vm10, %v694_v57 }
 0x25d   : > { %v780_v58 = vld [vmem:[#allocation7] sm:$0xff] }
 0x25e   : > { %781 = vxpose.xlu0.b32.start.end [1/1] (short) (narrow) %v780_v58, 16  ;;  %v776_v58 = vld [vmem:[%s2582_s19] sm:$0xff] }
 0x287   : > { %2191 = vset.pattern.permute.xlu0 %v2359_v59 }
 0x28b   : > { %698 = vrot.lane.b32.xlu0 %v686_v51, %s2358_s0  ;;  %v1122_v51 = vsub.s32 3, %v2599_v31 }
 0x2a5   : > { %v753_v61 = vpop.f32.mrf.mxu0 }
 0x2a6   : > { %v754_v62 = vadd.f32 %v1944_v60, %v753_v61 }
 0x2a7   : > { %v2031_v63 = vpop.f32.mrf.mxu0 }
 0x2a8   : > { %v760_v0 = vmin.f32 %v754_v62, 20.0  ;;  %vm759_vm12 = vcmp.gt.f32.partialorder %v754_v62, 20.0  ;;  %v1223_v63 = vsub.s32 4, %v2599_v31 }
 0x2a9   : > { %v756_v2 = vpop.f32.mrf.mxu0 }
 0x2aa   : > { %v761_v3 = vmul.f32 1.442695, %v760_v0 }
 0x2ab   : > { %v2032_v4 = vpop.f32.mrf.mxu0 }
 0x2ac   : > { %2206 = vpow2.f32 %v761_v3 }
 0x2b9   : > { %v2207_v5 = vpop.eup %2206 }
 0x2ba   : > { %v763_v6 = vadd.f32 1.0, %v2207_v5  ;;  %v766_v7 = vmul.f32 -0.5, %v2207_v5  ;;  %v769_v9 = vand.u32 2147483647, %v2207_v5 }
 0x2bc   : > { %2208 = vlog2.f32 %v763_v6  ;;  %v767_v8 = vadd.f32 1.0, %v766_v7  ;;  %vm770_vm11 = vcmp.lt.f32.partialorder %v769_v9, 0.0004427343 }
 0x2bd   : > { %2210 = vpow2.f32 %v1932_v25 }
 0x2be   : > { %v768_v13 = vmul.f32 %v2207_v5, %v767_v8 }
 0x2c9   : > { %v2209_v11 = vpop.eup %2208 }
 0x2ca   : > { %v765_v12 = vmul.f32 0.6931472, %v2209_v11  ;;  %v2211_v26 = vpop.eup %2210 }
 0x2cb   : > { %v530_v27 = vadd.f32 1.0, %v2211_v26  ;;  %v777_v26 = vld [vmem:[%s2582_s19 + $0x8] sm:$0xff] }
 0x2cc   : > { %v771_v14 = vsel %vm770_vm11, %v768_v13, %v765_v12 }
 0x2cd   : > { %v772_v15 = vsel %vm759_vm12, %v754_v62, %v771_v14  ;;  %2212 = vrcp.f32 %v530_v27 }
 0x2ce   : > { %773 = vst.msk [vmem:[#allocation4] sm:$0xff] %vm462_vm7, %v772_v15 }
 0x2d5   : > { %v2602_v33 = vld [vmem:[#allocation4] sm:$0xff] }
 0x2d6   : > { %v818_v34 = vrot.slane %v2602_v33, %v817_v32  ;;  %v1022_v45 = vrot.slane %v2602_v33, %v1021_v41  ;;  %v2624_v49 = vmul.f32 %v2602_v33, %v2562_v47  ;;  %v1224_v7 = vrot.slane %v2602_v33, %v1223_v63 }
 0x2d8   : > { %v819_v36 = vmul.f32 %v818_v34, %v2608_v35  ;;  %v820_v48 = vmul.f32 %v818_v34, %v2618_v43  ;;  %v1023_v50 = vmul.f32 %v1022_v45, %v2608_v35  ;;  %v840_v54 = vrot.slane %v2624_v49, %v817_v32 }
 0x2d9   : > { %v1024_v4 = vmul.f32 %v1022_v45, %v2618_v43  ;;  %v1225_v15 = vmul.f32 %v1224_v7, %v2608_v35  ;;  %v1226_v25 = vmul.f32 %v1224_v7, %v2618_v43  ;;  %v1244_v7 = vrot.slane %v2624_v49, %v1223_v63 }
 0x2da   : > { %v797_v16 = vpop.trf.xlu0  ;;  %v2213_v28 = vpop.eup %2212  ;;  %v821_v38 = vmul.f32 1.442695, %v819_v36  ;;  %v823_v52 = vmul.f32 1.442695, %v820_v48  ;;  %v1025_v55 = vmul.f32 1.442695, %v1023_v50 }
 0x2db   : > { %829 = vperm.xlu1 %2176, %v797_v16   ;;  %v533_v29 = vmul.f32 %v2213_v28, %v2534_v10  ;;  %v920_v10 = vsub.s32 1, %v2599_v31  ;;  %v1027_v13 = vmul.f32 1.442695, %v1024_v4  ;;  %v1526_v48 = vsub.s32 7, %v2599_v31 }
 0x2dc   : > { %2214 = vpow2.f32 %v821_v38 }
 0x2dd   : > { %v921_v39 = vrot.slane %v2602_v33, %v920_v10  ;;  %v941_v5 = vrot.slane %v2624_v49, %v920_v10  ;;  %v1229_v10 = vmul.f32 1.442695, %v1226_v25 }
 0x2de   : > { %v798_v22 = vpop.trf.xlu0 }
 0x2df   : > { %2177 = vset.pattern.permute.xlu1 %v2360_v17  ;;  %v922_v40 = vmul.f32 %v921_v39, %v2608_v35  ;;  %v923_v60 = vmul.f32 %v921_v39, %v2618_v43 }
 0x2e0   : > { %931 = vperm.xlu1 %2177, %v797_v16  }
 0x2e1   : > { %v924_v44 = vmul.f32 1.442695, %v922_v40  ;;  %v926_v3 = vmul.f32 1.442695, %v923_v60 }
 0x2e3   : > { %2216 = vpow2.f32 %v924_v44 }
 0x2e4   : > { %2178 = vset.pattern.permute.xlu1 %v2361_v18  ;;  %2218 = vpow2.f32 %v823_v52 }
 0x2e5   : > { %1032 = vperm.xlu1 %2178, %v797_v16   ;;  %2220 = vpow2.f32 %v1025_v55 }
 0x2e6   : > { %2222 = vpow2.f32 %v926_v3 }
 0x2e9   : > { %2179 = vset.pattern.permute.xlu1 %v2362_v19  ;;  %v2215_v57 = vpop.eup %2214 }
 0x2ea   : > { %1133 = vperm.xlu1 %2179, %v797_v16   ;;  %v825_v61 = vmul.f32 %v2215_v57, %v776_v58 }
 0x2ee   : > { %2180 = vset.pattern.permute.xlu1 %v2363_v20 }
 0x2ef   : > { %1234 = vperm.xlu1 %2180, %v797_v16  }
 0x2f0   : > { %v2217_v8 = vpop.eup %2216 }
 0x2f3   : > { %2181 = vset.pattern.permute.xlu1 %v2364_v21 }
 0x2f4   : > { %1335 = vperm.xlu1 %2181, %v797_v16  }
 0x2f8   : > { %2182 = vset.pattern.permute.xlu1 %v2365_v23 }
 0x2f9   : > { %1436 = vperm.xlu1 %2182, %v797_v16  }
 0x2fd   : > { %2183 = vset.pattern.permute.xlu1 %v2357_v56  ;;  %v699_v24 = vpop.permute.xlu0 %698  ;;  %v1123_v56 = vrot.slane %v2602_v33, %v1122_v51 }
 0x2fe   : > { %701 = vst.msk [vmem:[#allocation8] sm:$0xff] %vm696_vm10, %v699_v24  ;;  %834 = vperm.xlu1 %2183, %v798_v22  }
 0x2ff   : > { %v1124_v62 = vmul.f32 %v1123_v56, %v2608_v35  ;;  %v1125_v14 = vmul.f32 %v1123_v56, %v2618_v43 }
 0x301   : > { %v1126_v6 = vmul.f32 1.442695, %v1124_v62 }
 0x302   : > { %2184 = vset.pattern.permute.xlu1 %v2360_v17 }
 0x303   : > { %935 = vperm.xlu1 %2184, %v798_v22   ;;  %2224 = vpow2.f32 %v1126_v6 }
 0x304   : > { %2226 = vpow2.f32 %v1027_v13 }
 0x305   : > { %v2666_v57 = vld [vmem:[#allocation8] sm:$0xff] }
 0x306   : > { %v946_v4 = vrot.slane %v2666_v57, 1 }
 0x307   : > { %2185 = vset.pattern.permute.xlu1 %v2361_v18 }
 0x308   : > { %1036 = vperm.xlu1 %2185, %v798_v22  }
 0x30c   : > { %2186 = vset.pattern.permute.xlu1 %v2362_v19  ;;  %v1128_v19 = vmul.f32 1.442695, %v1125_v14 }
 0x30d   : > { %1137 = vperm.xlu1 %2186, %v798_v22  }
 0x30e   : > { %2228 = vpow2.f32 %v1128_v19  ;;  %v1047_v19 = vrot.slane %v2666_v57, 2 }
 0x311   : > { %2187 = vset.pattern.permute.xlu1 %v2363_v20  ;;  %v2219_v20 = vpop.eup %2218 }
 0x312   : > { %1238 = vperm.xlu1 %2187, %v798_v22   ;;  %v2221_v24 = vpop.eup %2220  ;;  %v826_v34 = vmul.f32 %v2219_v20, %v777_v26 }
 0x313   : > { %v2223_v40 = vpop.eup %2222 }
 0x314   : > { %v2225_v50 = vpop.eup %2224 }
 0x316   : > { %2188 = vset.pattern.permute.xlu1 %v2364_v21  ;;  %v1042_v21 = vrot.slane %v2624_v49, %v1021_v41 }
 0x317   : > { %1339 = vperm.xlu1 %2188, %v798_v22  }
 0x31b   : > { %2189 = vset.pattern.permute.xlu1 %v2365_v23 }
 0x31c   : > { %1440 = vperm.xlu1 %2189, %v798_v22  }
 0x320   : > { %2190 = vset.pattern.permute.xlu1 %v2359_v59 }
 0x321   : > { %1541 = vperm.xlu1 %2190, %v798_v22   ;;  %v1227_v22 = vmul.f32 1.442695, %v1225_v15 }
 0x323   : > { %2230 = vpow2.f32 %v1227_v22 }
 0x324   : > { %2232 = vpow2.f32 %v1229_v10 }
 0x325   : > { %1537 = vperm.xlu1 %2190, %v797_v16   ;;  %v1324_v16 = vsub.s32 5, %v2599_v31 }
 0x327   : > { %v1325_v23 = vrot.slane %v2602_v33, %v1324_v16  ;;  %v1345_v25 = vrot.slane %v2624_v49, %v1324_v16 }
 0x329   : > { %535 = vrot.lane.b32.xlu1 %v533_v29, %s2366_s30  ;;  %v1425_v29 = vsub.s32 6, %v2599_v31  ;;  %v1326_v32 = vmul.f32 %v1325_v23, %v2608_v35  ;;  %v1327_v38 = vmul.f32 %v1325_v23, %v2618_v43  ;;  %s1790_s30 = sshll.u32 %s2582_s19, 4  ;;  %s2772_s30 = int_to_ptr.vmem [resolvable:$true] %s1790_s30 }
 0x32a   : > { %s2246_s0 = scalar_lea.vmem %s2772_s30, 256  ;;  %p2253_p1 = scmp.lt.s32.totalorder %s2772_s30, %s2251_s2 }
 0x32b   : > { %v1426_v41 = vrot.slane %v2602_v33, %v1425_v29  ;;  %v1328_v44 = vmul.f32 1.442695, %v1326_v32  ;;  %v1330_v56 = vmul.f32 1.442695, %v1327_v38  ;;  %v1249_v38 = vrot.slane %v2666_v57, 4  ;;  %p2247_p12 = scmp.ne.s32.totalorder %s2772_s30, %s2246_s0 }
 0x32d   : > { %2234 = vpow2.f32 %v1328_v44  ;;  %v1427_v60 = vmul.f32 %v1426_v41, %v2608_v35  ;;  %p2248_p13 = pnand %p2247_p12, %p2476_p4 }
 0x32e   : > { %2236 = vpow2.f32 %v1330_v56  ;;  %v1547_v56 = vrot.slane %v2624_v49, %v1526_v48 }
 0x32f   : > { %p2249_p0 = pneg %p2248_p13 }
 0x356   : > { %v830_v37 = vpop.permute.xlu1 %829 }
 0x357   : > { %v841_v59 = vmul.f32 %v840_v54, %v830_v37 }
 0x359   : > { %v843_v2 = vadd.f32 %v841_v59, %v825_v61  ;;  %v2227_v59 = vpop.eup %2226 }
 0x35a   : > { %v2229_v6 = vpop.eup %2228 }
 0x35b   : > { %v932_v42 = vpop.permute.xlu1 %931  ;;  %v928_v11 = vmul.f32 %v2217_v8, %v843_v2  ;;  %v1429_v8 = vmul.f32 1.442695, %v1427_v60  ;;  %v1451_v60 = vrot.slane %v2666_v57, 6 }
 0x35c   : > { %v942_v12 = vmul.f32 %v941_v5, %v932_v42  ;;  %v1143_v42 = vrot.slane %v2624_v49, %v1122_v51  ;;  %v1428_v51 = vmul.f32 %v1426_v41, %v2618_v43  ;;  %v1446_v41 = vrot.slane %v2624_v49, %v1425_v29 }
 0x35e   : > { %v944_v17 = vadd.f32 %v942_v12, %v928_v11  ;;  %v2231_v12 = vpop.eup %2230 }
 0x360   : > { %v1033_v46 = vpop.permute.xlu1 %1032  ;;  %v1029_v27 = vmul.f32 %v2221_v24, %v944_v17 }
 0x361   : > { %v1043_v28 = vmul.f32 %v1042_v21, %v1033_v46 }
 0x363   : > { %v1045_v37 = vadd.f32 %v1043_v28, %v1029_v27  ;;  %v1148_v27 = vrot.slane %v2666_v57, 3 }
 0x365   : > { %v2628_v53 = vpop.permute.xlu1 %1133 }
 0x366   : > { %v1144_v55 = vmul.f32 %v1143_v42, %v2628_v53  ;;  %v1527_v53 = vrot.slane %v2602_v33, %v1526_v48 }
 0x368   : > { %v1529_v33 = vmul.f32 %v1527_v53, %v2618_v43 }
 0x36a   : > { %v2636_v0 = vpop.permute.xlu1 %1234  ;;  %v1532_v20 = vmul.f32 1.442695, %v1529_v33 }
 0x36b   : > { %v1245_v14 = vmul.f32 %v1244_v7, %v2636_v0  ;;  %v2233_v0 = vpop.eup %2232 }
 0x36c   : > { %v2235_v28 = vpop.eup %2234 }
 0x36f   : > { %v2643_v9 = vpop.permute.xlu1 %1335 }
 0x370   : > { %v1346_v32 = vmul.f32 %v1345_v25, %v2643_v9 }
 0x374   : > { %v2648_v18 = vpop.permute.xlu1 %1436 }
 0x379   : > { %v835_v30 = vpop.permute.xlu1 %834 }
 0x37a   : > { %v842_v36 = vmul.f32 %v840_v54, %v835_v30  ;;  %v1130_v54 = vmul.f32 %v2225_v50, %v1045_v37  ;;  %v1447_v50 = vmul.f32 %v1446_v41, %v2648_v18 }
 0x37c   : > { %v844_v39 = vadd.f32 %v842_v36, %v826_v34  ;;  %v2237_v36 = vpop.eup %2236 }
 0x37e   : > { %v936_v45 = vpop.permute.xlu1 %935  ;;  %v929_v46 = vmul.f32 %v2223_v40, %v844_v39  ;;  %2034 = vmatpush3.msra.mxu0 %v844_v39 }
 0x37f   : > { %v943_v52 = vmul.f32 %v941_v5, %v936_v45  ;;  %2035 = vmatprep.subr.mxu0 %v2354_v1  ;;  %v1431_v5 = vmul.f32 1.442695, %v1428_v51 }
 0x380   : > { %2036 = vmatpush3.msra.mxu0 %v843_v2  ;;  %v1146_v2 = vadd.f32 %v1144_v55, %v1130_v54  ;;  %v1350_v54 = vrot.slane %v2666_v57, 5 }
 0x381   : > { %v945_v58 = vadd.f32 %v943_v52, %v929_v46  ;;  %2038 = vmatmul.mubr.msk.f32.vlgmr.msra.gmra.mxu0 %vm696_vm10, %v2666_v57  ;;  %2047 = vmatprep.subr.mxu0 %v2354_v1  ;;  %2238 = vpow2.f32 %v1431_v5  ;;  %v2199_v5 = vld [vmem:[%s2859_s9 + $0x10] sm:$0xff]  }
 0x382   : > { %2051 = vmatprep.mubr.msk.f32.mxu0 %vm2355_vm0, %v2354_v1  ;;  %v1231_v13 = vmul.f32 %v2231_v12, %v1146_v2  ;;  %2240 = vpow2.f32 %v1429_v8 }
 0x383   : > { %v1037_v61 = vpop.permute.xlu1 %1036  ;;  %v1030_v62 = vmul.f32 %v2227_v59, %v945_v58  ;;  %2041 = vmatpush3.msra.mxu1 %v945_v58  ;;  %2242 = vpow2.f32 %v1532_v20 }
 0x384   : > { %v1044_v3 = vmul.f32 %v1042_v21, %v1037_v61  ;;  %2042 = vmatprep.subr.mxu1 %v2354_v1  ;;  %v1528_v21 = vmul.f32 %v1527_v53, %v2608_v35  ;;  %v1247_v22 = vadd.f32 %v1245_v14, %v1231_v13 }
 0x385   : > { %2043 = vmatpush3.msra.mxu1 %v944_v17 }
 0x386   : > { %v1046_v11 = vadd.f32 %v1044_v3, %v1030_v62  ;;  %2045 = vmatmul.mubr.msk.f32.vlgmr.msra.gmra.mxu1 %vm696_vm10, %v946_v4  ;;  %2054 = vmatprep.subr.mxu1 %v2354_v1  ;;  %v1530_v35 = vmul.f32 1.442695, %v1528_v21  ;;  %v1332_v30 = vmul.f32 %v2235_v28, %v1247_v22  ;;  %v1552_v3 = vrot.slane %v2666_v57, 7  ;;  %v2198_v4 = vld [vmem:[%s2859_s9 + $0x18] sm:$0xff]   ;;  %v2200_v57 = vld [vmem:[%s2859_s9 + $0x8] sm:$0xff]  }
 0x387   : > { %2058 = vmatprep.mubr.msk.f32.mxu1 %vm2355_vm0, %v2354_v1 }
 0x388   : > { %v1138_v15 = vpop.permute.xlu1 %1137  ;;  %v1131_v17 = vmul.f32 %v2229_v6, %v1046_v11  ;;  %2048 = vmatpush3.msra.mxu0 %v1046_v11  ;;  %2244 = vpow2.f32 %v1530_v35  ;;  %v1348_v39 = vadd.f32 %v1346_v32, %v1332_v30  ;;  %v2201_v6 = vld [vmem:[%s2859_s9] sm:$0xff]  }
 0x389   : > { %v1145_v63 = vmul.f32 %v1143_v42, %v1138_v15  ;;  %2049 = vmatprep.subr.mxu0 %v2354_v1 }
 0x38a   : > { %2050 = vmatpush3.msra.mxu0 %v1045_v37 }
 0x38b   : > { %v1147_v43 = vadd.f32 %v1145_v63, %v1131_v17  ;;  %2052 = vmatmul.mubr.msk.f32.vlgmr.msra.gmra.mxu0 %vm696_vm10, %v1047_v19  ;;  %2061 = vmatprep.subr.mxu0 %v2354_v1 }
 0x38c   : > { %2065 = vmatprep.mubr.msk.f32.mxu0 %vm2355_vm0, %v2354_v1 }
 0x38d   : > { %v1239_v23 = vpop.permute.xlu1 %1238  ;;  %v1232_v24 = vmul.f32 %v2233_v0, %v1147_v43  ;;  %2055 = vmatpush3.msra.mxu1 %v1147_v43 }
 0x38e   : > { %v1246_v26 = vmul.f32 %v1244_v7, %v1239_v23  ;;  %2056 = vmatprep.subr.mxu1 %v2354_v1  ;;  %v2239_v40 = vpop.eup %2238 }
 0x38f   : > { %2057 = vmatpush3.msra.mxu1 %v1146_v2  ;;  %v2241_v42 = vpop.eup %2240 }
 0x390   : > { %v1248_v34 = vadd.f32 %v1246_v26, %v1232_v24  ;;  %2059 = vmatmul.mubr.msk.f32.vlgmr.msra.gmra.mxu1 %vm696_vm10, %v1148_v27  ;;  %2068 = vmatprep.subr.mxu1 %v2354_v1  ;;  %v1433_v46 = vmul.f32 %v2241_v42, %v1348_v39  ;;  %v2243_v29 = vpop.eup %2242 }
 0x391   : > { %2072 = vmatprep.mubr.msk.f32.mxu1 %vm2355_vm0, %v2354_v1 }
 0x392   : > { %v1340_v16 = vpop.permute.xlu1 %1339  ;;  %v1333_v10 = vmul.f32 %v2237_v36, %v1248_v34  ;;  %2062 = vmatpush3.msra.mxu0 %v1248_v34  ;;  %v1449_v18 = vadd.f32 %v1447_v50, %v1433_v46 }
 0x393   : > { %v1347_v37 = vmul.f32 %v1345_v25, %v1340_v16  ;;  %2063 = vmatprep.subr.mxu0 %v2354_v1 }
 0x394   : > { %2064 = vmatpush3.msra.mxu0 %v1247_v22 }
 0x395   : > { %v1349_v9 = vadd.f32 %v1347_v37, %v1333_v10  ;;  %2066 = vmatmul.mubr.msk.f32.vlgmr.msra.gmra.mxu0 %vm696_vm10, %v1249_v38  ;;  %2075 = vmatprep.subr.mxu0 %v2354_v1  ;;  %v2245_v31 = vpop.eup %2244  ;;  %v1954_v37 = vld [vmem:[%s2858_s8] ss:$0 sm:$0xff] }
 0x396   : > { %2079 = vmatprep.mubr.msk.f32.mxu0 %vm2355_vm0, %v2354_v1  ;;  %v1534_v48 = vmul.f32 %v2245_v31, %v1449_v18  ;;  %v1667_v38 = vmul.f32 %v1954_v37, %v2562_v47 }
 0x397   : > { %v1441_v44 = vpop.permute.xlu1 %1440  ;;  %v1434_v45 = vmul.f32 %v2239_v40, %v1349_v9  ;;  %2069 = vmatpush3.msra.mxu1 %v1349_v9 }
 0x398   : > { %v1448_v52 = vmul.f32 %v1446_v41, %v1441_v44  ;;  %2070 = vmatprep.subr.mxu1 %v2354_v1 }
 0x399   : > { %2071 = vmatpush3.msra.mxu1 %v1348_v39 }
 0x39a   : > { %v1450_v55 = vadd.f32 %v1448_v52, %v1434_v45  ;;  %2073 = vmatmul.mubr.msk.f32.vlgmr.msra.gmra.mxu1 %vm696_vm10, %v1350_v54  ;;  %2082 = vmatprep.subr.mxu1 %v2354_v1 }
 0x39b   : > { %2086 = vmatprep.mubr.msk.f32.mxu1 %vm2355_vm0, %v2354_v1 }
 0x39c   : > { %v1542_v51 = vpop.permute.xlu1 %1541  ;;  %v1535_v58 = vmul.f32 %v2243_v29, %v1450_v55  ;;  %2076 = vmatpush3.msra.mxu0 %v1450_v55 }
 0x39d   : > { %v1549_v59 = vmul.f32 %v1547_v56, %v1542_v51  ;;  %2077 = vmatprep.subr.mxu0 %v2354_v1 }
 0x39e   : > { %2078 = vmatpush3.msra.mxu0 %v1449_v18 }
 0x39f   : > { %v1551_v53 = vadd.f32 %v1549_v59, %v1535_v58  ;;  %2080 = vmatmul.mubr.msk.f32.vlgmr.msra.gmra.mxu0 %vm696_vm10, %v1451_v60  ;;  %2089 = vmatprep.subr.bf16.mxu0 %v2354_v1 }
 0x3a0   : > { %v1538_v49 = vpop.permute.xlu1 %1537  ;;  %2097 = vmatprep.mubr.msk.bf16.mxu0 %vm2355_vm0, %v2354_v1  ;;  %2090 = vmatpush3.bf16.msra.mxu0 %v2198_v4 }
 0x3a1   : > { %1657 = vst.msk [vmem:[%s2582_s19 + $0x8] sm:$0xff] %vm462_vm7, %v1551_v53  ;;  %v1548_v61 = vmul.f32 %v1547_v56, %v1538_v49  ;;  %2083 = vmatpush3.msra.mxu1 %v1551_v53  ;;  %2091 = vmatprep.subr.bf16.mxu0 %v2354_v1 }
 0x3a2   : > { %2084 = vmatprep.subr.mxu1 %v2354_v1 }
 0x3a3   : > { %v1550_v62 = vadd.f32 %v1548_v61, %v1534_v48 }
 0x3a4   : > { %v536_v2 = vpop.permute.xlu1 %535  ;;  %2092 = vmatpush3.bf16.msra.mxu0 %v2199_v5 }
 0x3a5   : > { %1656 = vst.msk [vmem:[%s2582_s19] sm:$0xff] %vm462_vm7, %v1550_v62  ;;  %539 = vst.msk [vmem:[#allocation5] sm:$0xff] %vm462_vm7, %v536_v2  ;;  %2085 = vmatpush3.msra.mxu1 %v1550_v62  ;;  %2093 = vmatprep.subr.bf16.mxu0 %v2354_v1  ;;  %s2252_s19 = scalar_lea.vmem %s2251_s2, 512 }
 0x3a6   : > { %2087 = vmatmul.mubr.msk.f32.vlgmr.msra.gmra.mxu1 %vm696_vm10, %v1552_v3  ;;  %p2254_p2 = scmp.lt.s32.totalorder %s2252_s19, %s2246_s0 }
 0x3a8   : > { %2094 = vmatpush3.bf16.msra.mxu0 %v2200_v57  ;;  %p2255_p3 = por %p2254_p2, %p2253_p1 }
 0x3a9   : > { %2095 = vmatprep.subr.bf16.mxu0 %v2354_v1 }
 0x3aa   : > { %p2256_p5 = pnand %p2255_p3, %p2249_p0 }
 0x3ac   : > { %2096 = vmatpush3.bf16.msra.mxu0 %v2201_v6  ;;  %v1669_v40 = vld [vmem:[#allocation5] sm:$0xff] }
 0x441   : > { %v914_v7 = vpop.f32.mrf.mxu0 }
 0x443   : > { %v2039_v8 = vpop.f32.mrf.mxu0 }
 0x446   : > { %v1015_v11 = vpop.f32.mrf.mxu1 }
 0x447   : > { %v1626_v43 = vrot.slane %v1015_v11, 7 }
 0x448   : > { %v2046_v33 = vpop.f32.mrf.mxu1 }
 0x449   : > { %v1646_v24 = vsel %vm715_vm8, %v914_v7, %v1626_v43 }
 0x44b   : > { %v1116_v12 = vpop.f32.mrf.mxu0 }
 0x44c   : > { %v1629_v0 = vrot.slane %v1116_v12, 6 }
 0x44d   : > { %v2053_v13 = vpop.f32.mrf.mxu0 }
 0x44e   : > { %v1648_v26 = vsel %vm1647_vm13, %v1646_v24, %v1629_v0 }
 0x450   : > { %v1217_v14 = vpop.f32.mrf.mxu1 }
 0x451   : > { %v1632_v22 = vrot.slane %v1217_v14, 5 }
 0x452   : > { %v2060_v15 = vpop.f32.mrf.mxu1 }
 0x453   : > { %v1649_v28 = vsel %vm544_vm3, %v1648_v26, %v1632_v22 }
 0x455   : > { %v1318_v17 = vpop.f32.mrf.mxu0 }
 0x456   : > { %v1635_v1 = vrot.slane %v1318_v17, 4 }
 0x457   : > { %v2067_v63 = vpop.f32.mrf.mxu0 }
 0x458   : > { %v1651_v35 = vsel %vm1650_vm14, %v1649_v28, %v1635_v1 }
 0x45a   : > { %v1419_v19 = vpop.f32.mrf.mxu1 }
 0x45b   : > { %v1638_v25 = vrot.slane %v1419_v19, 3 }
 0x45c   : > { %v2074_v20 = vpop.f32.mrf.mxu1 }
 0x45d   : > { %v1652_v32 = vsel %vm599_vm6, %v1651_v35, %v1638_v25 }
 0x45f   : > { %v1520_v21 = vpop.f32.mrf.mxu0 }
 0x460   : > { %v1641_v27 = vrot.slane %v1520_v21, 2 }
 0x461   : > { %v2081_v23 = vpop.f32.mrf.mxu0 }
 0x462   : > { %v1653_v36 = vsel %vm584_vm5, %v1652_v32, %v1641_v27 }
 0x466   : > { %v1621_v30 = vpop.f32.mrf.mxu1 }
 0x467   : > { %v1644_v34 = vrot.slane %v1621_v30, 1 }
 0x468   : > { %v2088_v16 = vpop.f32.mrf.mxu1 }
 0x469   : > { %v1654_v10 = vsel %vm569_vm4, %v1653_v36, %v1644_v34 }
 0x46a   : > { %1655 = vst.msk [vmem:[#allocation6] sm:$0xff] %vm462_vm7, %v1654_v10 }
 0x471   : > { %v1658_v39 = vld [vmem:[#allocation6] sm:$0xff] }
 0x472   : > { %v1668_v9 = vadd.f32 %v1667_v38, %v1658_v39 }
 0x474   : > { %v1670_v41 = vmul.f32 %v1669_v40, %v1668_v9 }
 0x476   : > { %v1679_v42 = vpack.c.bf16 %v1670_v41, %v1670_v41 }
 0x478   : > { %2098 = vmatmul.mubr.msk.bf16.vlgmr.msra.gmra.mxu0 %vm462_vm7, %v1679_v42 }
 0x479   : > { %2259 = shalt.err (!%p2256_p5)
}
 0x47a   : > { %s2260_s20 = scalar_lea.hbm %s2770_s27, 256  ;;  %s2264_s1 = scalar_lea.hbm %s2862_s12, 512 }
 0x47b   : > { %p2261_p6 = scmp.ne.s32.totalorder %s2770_s27, %s2260_s20  ;;  %p2265_p10 = scmp.lt.s32.totalorder %s2770_s27, %s2862_s12 }
 0x47c   : > { %p2266_p11 = scmp.lt.s32.totalorder %s2264_s1, %s2260_s20 }
 0x47d   : > { %p2262_p7 = pnand %p2261_p6, %p2476_p4 }
 0x47e   : > { %p2267_p12 = por %p2266_p11, %p2265_p10 }
 0x47f   : > { %p2263_p9 = pneg %p2262_p7 }
 0x481   : > { %p2268_p13 = pnand %p2267_p12, %p2263_p9 }
 0x483   : > { %2271 = shalt.err (!%p2268_p13)
}
 0x484   : > { %s2368_s2 = smov 128   ;;  %s2369_s0 = smov 8  }
 0x485   : > { %s2877_s19 = scalar_lea.sflag [#allocation12], %s2579_s17  ;;  %s1925_s28 = sshll.u32 %s2579_s17, 3 }
 0x486   : > { %2102 = dma.vmem_to_hbm [thread:$0]  (%p2476_p4), %s2772_s30, 256, %s2770_s27, %s2877_s19, %s2368_s2, %s2368_s2, %s2369_s0  }
 0x487   : > { %s1962_s3 = sshll.u32 %s2344_s24, 7  ;;  %s430_s18 = scalar_lea.vmem [#allocation9], %s1925_s28 }
 0x488   : > { %s1774_s20 = sshll.u32 %s430_s18, 4  ;;  %s2802_s4 = scalar_lea.hbm %s2860_s10, %s1962_s3  ;;  %s2804_s20 = int_to_ptr.vmem [resolvable:$true] %s1774_s20 }
 0x489   : > { %s1751_s5 = scalar_lea.sflag [#allocation10], %s2579_s17  ;;  %s2272_s30 = scalar_lea.vmem %s2804_s20, 128 }
 0x48a   : > { %p2273_p0 = scmp.ne.s32.totalorder %s2804_s20, %s2272_s30  ;;  %s2370_s24 = smov [#allocation9]  }
 0x48b   : > { %s2276_s27 = sshll.u32 %s2370_s24, 4  ;;  %s2277_s27 = int_to_ptr.vmem [resolvable:$false] %s2276_s27 }
 0x48c   : > { %p2274_p1 = pnand %p2273_p0, %p2476_p4  ;;  %s2278_s2 = scalar_lea.vmem %s2277_s27, 256 }
 0x48d   : > { %p2279_p3 = scmp.lt.s32.totalorder %s2804_s20, %s2277_s27  ;;  %p2280_p5 = scmp.lt.s32.totalorder %s2278_s2, %s2272_s30 }
 0x48e   : > { %p2275_p2 = pneg %p2274_p1 }
 0x48f   : > { %p2281_p6 = por %p2280_p5, %p2279_p3 }
 0x491   : > { %p2282_p7 = pnand %p2281_p6, %p2275_p2 }
 0x538   : > { %v1741_v47 = vpop.f32.mrf.mxu0 }
 0x539   : > { %1747 = vst.msk [vmem:[%s430_s18] sm:$0xff] %vm483_vm2, %v1741_v47 }
 0x53a   : > { %v2099_v44 = vpop.f32.mrf.mxu0 }
 0x53b   : > { %2285 = shalt.err (!%p2282_p7)
}
 0x53c   : > { %s2286_s0 = scalar_lea.hbm %s2802_s4, 128  ;;  %s2290_s28 = scalar_lea.hbm %s2860_s10, 256 }
 0x53d   : > { %p2287_p9 = scmp.ne.s32.totalorder %s2802_s4, %s2286_s0  ;;  %p2291_p12 = scmp.lt.s32.totalorder %s2802_s4, %s2860_s10 }
 0x53e   : > { %p2292_p13 = scmp.lt.s32.totalorder %s2290_s28, %s2286_s0 }
 0x53f   : > { %p2288_p10 = pnand %p2287_p9, %p2476_p4 }
 0x540   : > { %p2293_p0 = por %p2292_p13, %p2291_p12 }
 0x541   : > { %p2289_p11 = pneg %p2288_p10 }
 0x543   : > { %p2294_p1 = pnand %p2293_p0, %p2289_p11 }
 0x545   : > { %2297 = shalt.err (!%p2294_p1)
}
 0x546   : > { %2101 = dma.vmem_to_hbm [thread:$0]  (%p2476_p4), %s2804_s20, 128, %s2802_s4, %s1751_s5   ;;  %v1744_v45 = vpop.f32.mrf.mxu0 }
 0x548   : > { %v2100_v46 = vpop.f32.mrf.mxu0 }
 0x549 PF: > { %p2112_p2 = scmp.ge.s32.totalorder %s2352_s26, 2  ;;  %s1805_s14 = sand.u32 1, %s2332_s21  }
 0x54a   : > { %s1806_s1 = scalar_lea.sflag [#allocation10], %s1805_s14 }
 0x54b   : > { %p2106_p3 = pnand %p2112_p2, %p2483_p8 }
 0x54d   : > { %p2107_p5 = pneg %p2106_p3 }
 0x54f   : > { %2323 = dma.done.wait (%p2107_p5), %s1806_s1, 128  }
 0x550   : > { %2325 = vsyncadd (%p2107_p5), %s1806_s1, 4294967168  ;;  %s1822_s30 = scalar_lea.sflag [#allocation12], %s1805_s14 }
 0x551   : > { %2327 = dma.done.wait (%p2107_p5), %s1822_s30, 256  }
 0x552   : > { %2329 = vsyncadd (%p2107_p5), %s1822_s30, 4294967040  ;;  %s29_s26 = sadd.s32 1, %s2352_s26   ;;  %s2878_s21 = smov %s2336_s22 }
 0x553   : > { %p26_p4 = scmp.ge.s32.totalorder %s29_s26, 4   ;;  %s2879_s22 = smov %s2340_s23 }
 0x554   : > { %s2880_s23 = smov %s2489_s16  ;;  %s2881_s24 = smov %s2348_s25 }
 0x555   : > { %s2882_s25 = smov %s2884_s29  ;;  %28 = sbr.rel (!%p26_p4) target bundleno = 13 (0xd), region = 128 }
 0x55a   :  { %1827 = vsyncpa [#allocation10], 1 }
 0x55b   :  { %1829 = vsyncpa [#allocation10 + $0x1], 1 }
 0x55c   :  { %1830 = vsyncpa [#allocation12], 1 }
 0x55d   :  { %1832 = vsyncpa [#allocation12 + $0x1], 1 }

</bundles_post_ra>
